<compile_context>
chip_gen: v7x
topology: tpu7x:2x2x1
jax: 0.10.0
libtpu: 0.0.40
codegen_flags: <defaults>
</compile_context>

<pallas_src>
import jax
import jax.numpy as jnp
from jax.experimental import pallas as pl
from jax.experimental.pallas import tpu as pltpu


def _round_up(n, m):
    return ((n + m - 1) // m) * m


# ----------------------------------------------------------------------------
# Fused VAE forward kernel
# ----------------------------------------------------------------------------
def make_vae_kernel(n_enc_hidden: int, n_dec_hidden: int, latent_dim: int):
    """Kernel ref order (all VMEM, one batch tile per grid step):
      x, eps,
      [W, b] * n_enc_hidden,
      W_muvar, b_muvar,                      # fused fc_mu | fc_logvar head
      [W, b] * n_dec_hidden, W_out, b_out,   # W_out/b_out zero-padded to 896 cols
      recon_out, muvar_out
    Weights are bf16; biases and all elementwise math are f32; MXU accumulates f32.
    """

    def kernel(*refs):
        idx = 0
        x = refs[idx][...]
        idx += 1
        eps = refs[idx][...]
        idx += 1

        # ---- encoder: (Linear -> ReLU) * n_enc_hidden ----
        h = x.astype(jnp.bfloat16)
        for _ in range(n_enc_hidden):
            w = refs[idx][...]
            b = refs[idx + 1][...]
            idx += 2
            h = jnp.maximum(
                jnp.dot(h, w, preferred_element_type=jnp.float32) + b, 0.0
            ).astype(jnp.bfloat16)

        # ---- fused fc_mu | fc_logvar head: one MXU push, one lane-dense slab ----
        w_mv = refs[idx][...]
        b_mv = refs[idx + 1][...]
        idx += 2
        muvar = jnp.dot(h, w_mv, preferred_element_type=jnp.float32) + b_mv
        mu = muvar[:, :latent_dim]
        logvar = muvar[:, latent_dim:]

        # ---- reparameterize (f32): z = mu + eps * exp(0.5 * logvar) ----
        z = (mu + eps * jnp.exp(0.5 * logvar)).astype(jnp.bfloat16)

        # ---- decoder: (Linear -> ReLU) * n_dec_hidden ----
        for _ in range(n_dec_hidden):
            w = refs[idx][...]
            b = refs[idx + 1][...]
            idx += 2
            z = jnp.maximum(
                jnp.dot(z, w, preferred_element_type=jnp.float32) + b, 0.0
            ).astype(jnp.bfloat16)

        # ---- final Linear (padded to 896 cols) + Sigmoid (EUP exp + exact reciprocal) ----
        w_o = refs[idx][...]
        b_o = refs[idx + 1][...]
        idx += 2
        logits = jnp.dot(z, w_o, preferred_element_type=jnp.float32) + b_o
        recon = pl.reciprocal(1.0 + jnp.exp(-logits), approx=False)

        recon_ref, muvar_ref = refs[idx], refs[idx + 1]
        recon_ref[...] = recon      # lane-dense (TB, 896) store
        muvar_ref[...] = muvar      # single (TB, 2*latent) store

    return kernel


# ----------------------------------------------------------------------------
# Parameter packing: fuse mu/logvar head, pad output layer, cast weights to bf16
# ----------------------------------------------------------------------------
def _prepare_params(params, n_enc_hidden, n_dec_hidden, out_dim, out_dim_pad):
    kp = []
    idx = 0
    for _ in range(n_enc_hidden):
        w, b = params[idx], params[idx + 1]
        idx += 2
        kp += [w.astype(jnp.bfloat16), b.astype(jnp.float32)]
    w_mu, b_mu = params[idx], params[idx + 1]
    idx += 2
    w_lv, b_lv = params[idx], params[idx + 1]
    idx += 2
    kp += [
        jnp.concatenate([w_mu, w_lv], axis=1).astype(jnp.bfloat16),
        jnp.concatenate([b_mu, b_lv], axis=1).astype(jnp.float32),
    ]
    for _ in range(n_dec_hidden):
        w, b = params[idx], params[idx + 1]
        idx += 2
        kp += [w.astype(jnp.bfloat16), b.astype(jnp.float32)]
    w_o, b_o = params[idx], params[idx + 1]
    pad = out_dim_pad - out_dim
    kp += [
        jnp.pad(w_o, ((0, 0), (0, pad))).astype(jnp.bfloat16),
        jnp.pad(b_o, ((0, 0), (0, pad))).astype(jnp.float32),
    ]
    return kp


# ----------------------------------------------------------------------------
# Wrapper
# ----------------------------------------------------------------------------
def vae_forward(x_img, eps, params, n_enc_hidden, n_dec_hidden, latent_dim,
                in_dim, out_dim, batch_tile=256):
    """params: flat f32 list [enc (W,b)*, W_mu,b_mu, W_logvar,b_logvar, dec (W,b)*, W_out,b_out]
    with weights [in, out] and biases [1, out]."""
    x = x_img.reshape(-1, in_dim).astype(jnp.float32)       # x.view(-1, 784)
    batch = x.shape[0]
    out_dim_pad = _round_up(out_dim, 128)                    # 784 -> 896 lane-dense

    # Batch tiling: large batches use 256-row tiles (fills MXU M on v6e/v7x); tiny
    # batches just round up to a sublane multiple so the grid is a single step.
    TB = batch_tile if batch >= batch_tile else _round_up(batch, 8)
    batch_pad = _round_up(batch, TB)
    eps_f = eps.astype(jnp.float32)
    if batch_pad != batch:
        x = jnp.pad(x, ((0, batch_pad - batch), (0, 0)))
        eps_f = jnp.pad(eps_f, ((0, batch_pad - batch), (0, 0)))

    kparams = _prepare_params(params, n_enc_hidden, n_dec_hidden, out_dim, out_dim_pad)
    kernel = make_vae_kernel(n_enc_hidden, n_dec_hidden, latent_dim)

    grid = (batch_pad // TB,)

    def act_spec(feat):
        return pl.BlockSpec((TB, feat), lambda i: (i, 0))

    def weight_spec(arr):
        # Full-array block, constant block index -> fetched once, VMEM-resident.
        return pl.BlockSpec(arr.shape, lambda i: (0, 0))

    in_specs = [act_spec(in_dim), act_spec(latent_dim)] + [weight_spec(p) for p in kparams]
    out_specs = (
        pl.BlockSpec((TB, out_dim_pad), lambda i: (i, 0)),
        pl.BlockSpec((TB, 2 * latent_dim), lambda i: (i, 0)),
    )

    recon_full, muvar_full = pl.pallas_call(
        kernel,
        out_shape=(
            jax.ShapeDtypeStruct((batch_pad, out_dim_pad), jnp.float32),
            jax.ShapeDtypeStruct((batch_pad, 2 * latent_dim), jnp.float32),
        ),
        grid=grid,
        in_specs=in_specs,
        out_specs=out_specs,
        compiler_params=pltpu.CompilerParams(
            # batch axis is independent -> shard across v7x's 2 TensorCores
            dimension_semantics=("parallel",),
            # ~1 MiB bf16 weights (double-buffered) + f32 activation tiles (~10 MiB at
            # TB=256); 32 MiB leaves headroom and stays at half of v7x's 64 MiB/TC.
            vmem_limit_bytes=32 << 20,
        ),
    )(x, eps_f, *kparams)

    recon = recon_full[:batch, :out_dim]
    mu = muvar_full[:batch, :latent_dim]
    logvar = muvar_full[:batch, latent_dim:]
    return recon, mu, logvar


# ----------------------------------------------------------------------------
# Pure-JAX reference (same bf16 matmul / f32 accumulate recipe, unfused params)
# ----------------------------------------------------------------------------
def vae_forward_ref(x_img, eps, params, n_enc_hidden, n_dec_hidden, in_dim):
    def mm(a, w, b):
        return jnp.dot(a.astype(jnp.bfloat16), w.astype(jnp.bfloat16),
                       preferred_element_type=jnp.float32) + b

    x = x_img.reshape(-1, in_dim).astype(jnp.float32)
    idx = 0
    h = x
    for _ in range(n_enc_hidden):
        w, b = params[idx], params[idx + 1]
        idx += 2
        h = jnp.maximum(mm(h, w, b), 0.0)
    w_mu, b_mu = params[idx], params[idx + 1]
    idx += 2
    w_lv, b_lv = params[idx], params[idx + 1]
    idx += 2
    mu = mm(h, w_mu, b_mu)
    logvar = mm(h, w_lv, b_lv)
    z = mu + eps * jnp.exp(0.5 * logvar)
    for _ in range(n_dec_hidden):
        w, b = params[idx], params[idx + 1]
        idx += 2
        z = jnp.maximum(mm(z, w, b), 0.0)
    w_o, b_o = params[idx], params[idx + 1]
    logits = mm(z, w_o, b_o)
    return jax.nn.sigmoid(logits), mu, logvar


# ----------------------------------------------------------------------------
# Deterministic parameter init (PyTorch nn.Linear-style uniform bounds)
# ----------------------------------------------------------------------------
def init_linear(key, in_features, out_features):
    kw, kb = jax.random.split(key)
    bound = 1.0 / jnp.sqrt(jnp.float32(in_features))
    w = jax.random.uniform(kw, (in_features, out_features), jnp.float32, -bound, bound)
    b = jax.random.uniform(kb, (1, out_features), jnp.float32, -bound, bound)
    return w, b


if __name__ == "__main__":
    # Architecture consistent with forward's x.view(-1, 784):
    #   encoder_layers = [(784, 256), (256, 32)]  -> 1 hidden (Linear, ReLU), latent 32
    #   decoder_layers = [(32, 256), (256, 784)]  -> 1 hidden (Linear, ReLU), output 784
    encoder_layers = [(784, 256), (256, 32)]
    decoder_layers = [(32, 256), (256, 784)]
    n_enc_hidden = len(encoder_layers) - 1
    n_dec_hidden = len(decoder_layers) - 1
    latent_dim = encoder_layers[-1][1]
    in_dim = encoder_layers[0][0]
    out_dim = decoder_layers[-1][1]

    key = jax.random.PRNGKey(0)
    keys = jax.random.split(key, 16)

    # Parameters in the original (unfused, unpadded) order.
    params = []
    k = 0
    for in_f, out_f in encoder_layers[:-1]:
        params.extend(init_linear(keys[k], in_f, out_f))
        k += 1
    params.extend(init_linear(keys[k], *encoder_layers[-1]))  # fc_mu
    k += 1
    params.extend(init_linear(keys[k], *encoder_layers[-1]))  # fc_logvar
    k += 1
    for in_f, out_f in decoder_layers[:-1]:
        params.extend(init_linear(keys[k], in_f, out_f))
        k += 1
    params.extend(init_linear(keys[k], *decoder_layers[-1]))  # final Linear
    k += 1

    # Inputs: MNIST-like images, batch=8, NCHW (B, 1, 28, 28), values in [0, 1].
    batch = 8
    x_img = jax.random.uniform(keys[k], (batch, 1, 28, 28), jnp.float32)
    k += 1
    # torch.randn_like replaced by a deterministic JAX normal draw
    eps = jax.random.normal(keys[k], (batch, latent_dim), jnp.float32)

    recon, mu, logvar = vae_forward(
        x_img, eps, params, n_enc_hidden, n_dec_hidden, latent_dim, in_dim, out_dim
    )
    jax.block_until_ready((recon, mu, logvar))

    # Correctness check vs pure-JAX reference (bf16 matmuls -> relaxed tolerance).
    recon_r, mu_r, logvar_r = vae_forward_ref(
        x_img, eps, params, n_enc_hidden, n_dec_hidden, in_dim
    )
    assert recon.shape == (batch, out_dim)
    assert mu.shape == (batch, latent_dim) and logvar.shape == (batch, latent_dim)
    assert jnp.allclose(recon, recon_r, atol=1e-2, rtol=1e-2)
    assert jnp.allclose(mu, mu_r, atol=1e-2, rtol=1e-2)
    assert jnp.allclose(logvar, logvar_r, atol=1e-2, rtol=1e-2)

    print("KERNEL_OK")
</pallas_src>

<mosaic_0001>
module attributes {stable_mosaic.version = 11 : i64} {
  func.func @kernel(%arg0: i32, %arg1: memref<8x784xf32, #tpu.memory_space<vmem>>, %arg2: memref<8x32xf32, #tpu.memory_space<vmem>>, %arg3: memref<784x256xbf16, #tpu.memory_space<vmem>>, %arg4: memref<1x256xf32, #tpu.memory_space<vmem>>, %arg5: memref<256x64xbf16, #tpu.memory_space<vmem>>, %arg6: memref<1x64xf32, #tpu.memory_space<vmem>>, %arg7: memref<32x256xbf16, #tpu.memory_space<vmem>>, %arg8: memref<1x256xf32, #tpu.memory_space<vmem>>, %arg9: memref<256x896xbf16, #tpu.memory_space<vmem>>, %arg10: memref<1x896xf32, #tpu.memory_space<vmem>>, %arg11: memref<8x896xf32, #tpu.memory_space<vmem>>, %arg12: memref<8x64xf32, #tpu.memory_space<vmem>>) attributes {dimension_semantics = [#tpu.dimension_semantics<parallel>], iteration_bounds = array<i64: 1>, scalar_prefetch = 0 : i64, scratch_operands = 0 : i64, tpu.core_type = #tpu.core_type<tc>, window_params = [{transform_indices = @transform_0, window_bounds = array<i64: 8, 784>}, {transform_indices = @transform_1, window_bounds = array<i64: 8, 32>}, {pipeline_mode = #tpu.pipeline_mode<synchronous>, transform_indices = @transform_2, window_bounds = array<i64: 784, 256>}, {pipeline_mode = #tpu.pipeline_mode<synchronous>, transform_indices = @transform_3, window_bounds = array<i64: 1, 256>}, {pipeline_mode = #tpu.pipeline_mode<synchronous>, transform_indices = @transform_4, window_bounds = array<i64: 256, 64>}, {pipeline_mode = #tpu.pipeline_mode<synchronous>, transform_indices = @transform_5, window_bounds = array<i64: 1, 64>}, {pipeline_mode = #tpu.pipeline_mode<synchronous>, transform_indices = @transform_6, window_bounds = array<i64: 32, 256>}, {pipeline_mode = #tpu.pipeline_mode<synchronous>, transform_indices = @transform_7, window_bounds = array<i64: 1, 256>}, {pipeline_mode = #tpu.pipeline_mode<synchronous>, transform_indices = @transform_8, window_bounds = array<i64: 256, 896>}, {pipeline_mode = #tpu.pipeline_mode<synchronous>, transform_indices = @transform_9, window_bounds = array<i64: 1, 896>}, {transform_indices = @transform_10, window_bounds = array<i64: 8, 896>}, {transform_indices = @transform_11, window_bounds = array<i64: 8, 64>}]} {
    %c0 = arith.constant 0 : index
    %c0_0 = arith.constant 0 : index
    %0 = vector.load %arg1[%c0, %c0_0] : memref<8x784xf32, #tpu.memory_space<vmem>>, vector<8x784xf32>
    %c0_1 = arith.constant 0 : index
    %c0_2 = arith.constant 0 : index
    %1 = vector.load %arg2[%c0_1, %c0_2] : memref<8x32xf32, #tpu.memory_space<vmem>>, vector<8x32xf32>
    %2 = arith.truncf %0 : vector<8x784xf32> to vector<8x784xbf16>
    %c0_3 = arith.constant 0 : index
    %c0_4 = arith.constant 0 : index
    %3 = vector.load %arg3[%c0_3, %c0_4] : memref<784x256xbf16, #tpu.memory_space<vmem>>, vector<784x256xbf16>
    %c0_5 = arith.constant 0 : index
    %c0_6 = arith.constant 0 : index
    %4 = vector.load %arg4[%c0_5, %c0_6] : memref<1x256xf32, #tpu.memory_space<vmem>>, vector<1x256xf32>
    %cst = arith.constant dense<0.000000e+00> : vector<8x256xf32>
    %5 = tpu.matmul %2, %3, %cst {dimension_numbers = #tpu.dot_dimension_numbers<[1], [0], [0], [1], [0, 0, 1, 1], [], []>} : vector<8x784xbf16>, vector<784x256xbf16>, vector<8x256xf32> -> vector<8x256xf32>
    %6 = vector.broadcast %4 : vector<1x256xf32> to vector<8x256xf32>
    %7 = arith.addf %5, %6 : vector<8x256xf32>
    %cst_7 = arith.constant 0.000000e+00 : f32
    %8 = vector.broadcast %cst_7 : f32 to vector<8x256xf32>
    %9 = arith.maximumf %7, %8 : vector<8x256xf32>
    %10 = arith.truncf %9 : vector<8x256xf32> to vector<8x256xbf16>
    %c0_8 = arith.constant 0 : index
    %c0_9 = arith.constant 0 : index
    %11 = vector.load %arg5[%c0_8, %c0_9] : memref<256x64xbf16, #tpu.memory_space<vmem>>, vector<256x64xbf16>
    %c0_10 = arith.constant 0 : index
    %c0_11 = arith.constant 0 : index
    %12 = vector.load %arg6[%c0_10, %c0_11] : memref<1x64xf32, #tpu.memory_space<vmem>>, vector<1x64xf32>
    %cst_12 = arith.constant dense<0.000000e+00> : vector<8x64xf32>
    %13 = tpu.matmul %10, %11, %cst_12 {dimension_numbers = #tpu.dot_dimension_numbers<[1], [0], [0], [1], [0, 0, 1, 1], [], []>} : vector<8x256xbf16>, vector<256x64xbf16>, vector<8x64xf32> -> vector<8x64xf32>
    %14 = vector.broadcast %12 : vector<1x64xf32> to vector<8x64xf32>
    %15 = arith.addf %13, %14 : vector<8x64xf32>
    %16 = vector.extract_strided_slice %15 {offsets = [0, 0], sizes = [8, 32], strides = [1, 1]} : vector<8x64xf32> to vector<8x32xf32>
    %17 = vector.extract_strided_slice %15 {offsets = [0, 32], sizes = [8, 32], strides = [1, 1]} : vector<8x64xf32> to vector<8x32xf32>
    %cst_13 = arith.constant 5.000000e-01 : f32
    %18 = vector.broadcast %cst_13 : f32 to vector<8x32xf32>
    %19 = arith.mulf %18, %17 : vector<8x32xf32>
    %20 = math.exp %19 : vector<8x32xf32>
    %21 = arith.mulf %1, %20 : vector<8x32xf32>
    %22 = arith.addf %16, %21 : vector<8x32xf32>
    %23 = arith.truncf %22 : vector<8x32xf32> to vector<8x32xbf16>
    %c0_14 = arith.constant 0 : index
    %c0_15 = arith.constant 0 : index
    %24 = vector.load %arg7[%c0_14, %c0_15] : memref<32x256xbf16, #tpu.memory_space<vmem>>, vector<32x256xbf16>
    %c0_16 = arith.constant 0 : index
    %c0_17 = arith.constant 0 : index
    %25 = vector.load %arg8[%c0_16, %c0_17] : memref<1x256xf32, #tpu.memory_space<vmem>>, vector<1x256xf32>
    %cst_18 = arith.constant dense<0.000000e+00> : vector<8x256xf32>
    %26 = tpu.matmul %23, %24, %cst_18 {dimension_numbers = #tpu.dot_dimension_numbers<[1], [0], [0], [1], [0, 0, 1, 1], [], []>} : vector<8x32xbf16>, vector<32x256xbf16>, vector<8x256xf32> -> vector<8x256xf32>
    %27 = vector.broadcast %25 : vector<1x256xf32> to vector<8x256xf32>
    %28 = arith.addf %26, %27 : vector<8x256xf32>
    %cst_19 = arith.constant 0.000000e+00 : f32
    %29 = vector.broadcast %cst_19 : f32 to vector<8x256xf32>
    %30 = arith.maximumf %28, %29 : vector<8x256xf32>
    %31 = arith.truncf %30 : vector<8x256xf32> to vector<8x256xbf16>
    %c0_20 = arith.constant 0 : index
    %c0_21 = arith.constant 0 : index
    %32 = vector.load %arg9[%c0_20, %c0_21] : memref<256x896xbf16, #tpu.memory_space<vmem>>, vector<256x896xbf16>
    %c0_22 = arith.constant 0 : index
    %c0_23 = arith.constant 0 : index
    %33 = vector.load %arg10[%c0_22, %c0_23] : memref<1x896xf32, #tpu.memory_space<vmem>>, vector<1x896xf32>
    %cst_24 = arith.constant dense<0.000000e+00> : vector<8x896xf32>
    %34 = tpu.matmul %31, %32, %cst_24 {dimension_numbers = #tpu.dot_dimension_numbers<[1], [0], [0], [1], [0, 0, 1, 1], [], []>} : vector<8x256xbf16>, vector<256x896xbf16>, vector<8x896xf32> -> vector<8x896xf32>
    %35 = vector.broadcast %33 : vector<1x896xf32> to vector<8x896xf32>
    %36 = arith.addf %34, %35 : vector<8x896xf32>
    %cst_25 = arith.constant 0.000000e+00 : f32
    %37 = vector.broadcast %cst_25 : f32 to vector<8x896xf32>
    %38 = arith.subf %37, %36 : vector<8x896xf32>
    %39 = math.exp %38 : vector<8x896xf32>
    %cst_26 = arith.constant 1.000000e+00 : f32
    %40 = vector.broadcast %cst_26 : f32 to vector<8x896xf32>
    %41 = arith.addf %40, %39 : vector<8x896xf32>
    %42 = tpu.reciprocal %41 : vector<8x896xf32> -> vector<8x896xf32>
    %c0_27 = arith.constant 0 : index
    %c0_28 = arith.constant 0 : index
    %43 = vector.load %arg11[%c0_27, %c0_28] : memref<8x896xf32, #tpu.memory_space<vmem>>, vector<8x896xf32>
    tpu.vector_store %arg11[%c0_27, %c0_28], %42 {strides = array<i32>} : memref<8x896xf32, #tpu.memory_space<vmem>>, vector<8x896xf32>,
    %c0_29 = arith.constant 0 : index
    %c0_30 = arith.constant 0 : index
    %44 = vector.load %arg12[%c0_29, %c0_30] : memref<8x64xf32, #tpu.memory_space<vmem>>, vector<8x64xf32>
    tpu.vector_store %arg12[%c0_29, %c0_30], %15 {strides = array<i32>} : memref<8x64xf32, #tpu.memory_space<vmem>>, vector<8x64xf32>,
    return
  }
  func.func @transform_0(%arg0: i32) -> (i32, i32) {
    %c0_i32 = arith.constant 0 : i32
    %c0_i32_0 = arith.constant 0 : i32
    return %arg0, %c0_i32 : i32, i32
  }
  func.func @transform_1(%arg0: i32) -> (i32, i32) {
    %c0_i32 = arith.constant 0 : i32
    %c0_i32_0 = arith.constant 0 : i32
    return %arg0, %c0_i32 : i32, i32
  }
  func.func @transform_2(%arg0: i32) -> (i32, i32) {
    %c0_i32 = arith.constant 0 : i32
    %c0_i32_0 = arith.constant 0 : i32
    %c0_i32_1 = arith.constant 0 : i32
    return %c0_i32, %c0_i32_0 : i32, i32
  }
  func.func @transform_3(%arg0: i32) -> (i32, i32) {
    %c0_i32 = arith.constant 0 : i32
    %c0_i32_0 = arith.constant 0 : i32
    %c0_i32_1 = arith.constant 0 : i32
    return %c0_i32, %c0_i32_0 : i32, i32
  }
  func.func @transform_4(%arg0: i32) -> (i32, i32) {
    %c0_i32 = arith.constant 0 : i32
    %c0_i32_0 = arith.constant 0 : i32
    %c0_i32_1 = arith.constant 0 : i32
    return %c0_i32, %c0_i32_0 : i32, i32
  }
  func.func @transform_5(%arg0: i32) -> (i32, i32) {
    %c0_i32 = arith.constant 0 : i32
    %c0_i32_0 = arith.constant 0 : i32
    %c0_i32_1 = arith.constant 0 : i32
    return %c0_i32, %c0_i32_0 : i32, i32
  }
  func.func @transform_6(%arg0: i32) -> (i32, i32) {
    %c0_i32 = arith.constant 0 : i32
    %c0_i32_0 = arith.constant 0 : i32
    %c0_i32_1 = arith.constant 0 : i32
    return %c0_i32, %c0_i32_0 : i32, i32
  }
  func.func @transform_7(%arg0: i32) -> (i32, i32) {
    %c0_i32 = arith.constant 0 : i32
    %c0_i32_0 = arith.constant 0 : i32
    %c0_i32_1 = arith.constant 0 : i32
    return %c0_i32, %c0_i32_0 : i32, i32
  }
  func.func @transform_8(%arg0: i32) -> (i32, i32) {
    %c0_i32 = arith.constant 0 : i32
    %c0_i32_0 = arith.constant 0 : i32
    %c0_i32_1 = arith.constant 0 : i32
    return %c0_i32, %c0_i32_0 : i32, i32
  }
  func.func @transform_9(%arg0: i32) -> (i32, i32) {
    %c0_i32 = arith.constant 0 : i32
    %c0_i32_0 = arith.constant 0 : i32
    %c0_i32_1 = arith.constant 0 : i32
    return %c0_i32, %c0_i32_0 : i32, i32
  }
  func.func @transform_10(%arg0: i32) -> (i32, i32) {
    %c0_i32 = arith.constant 0 : i32
    %c0_i32_0 = arith.constant 0 : i32
    return %arg0, %c0_i32 : i32, i32
  }
  func.func @transform_11(%arg0: i32) -> (i32, i32) {
    %c0_i32 = arith.constant 0 : i32
    %c0_i32_0 = arith.constant 0 : i32
    return %arg0, %c0_i32 : i32, i32
  }
}

</mosaic_0001>

<bundles_post_ra>
// kernel: tpu_custom_call.1
= control target key start
LH: loop header
LB: loop body
LE: loop exit
PB: predicated region body
PF: predicated region fallthrough
CT: control target
= control target key end

     0   :  { %17 = vsyncpa [#allocation3], 0  ;;  %s3113_s0 = inlined_call_operand.vmem [shape: f32[8,784], index: 0, kind: input, shape index: {}]   ;;  %s3114_s1 = inlined_call_operand.vmem [shape: f32[8,32], index: 1, kind: input, shape index: {}]   ;;  %s3115_s2 = inlined_call_operand.hbm [shape: bf16[784,256], index: 2, kind: input, shape index: {}]   ;;  %s3116_s3 = inlined_call_operand.vmem [shape: f32[1,256], index: 3, kind: input, shape index: {}]   ;;  %s3117_s4 = inlined_call_operand.vmem [shape: bf16[256,64], index: 4, kind: input, shape index: {}]   ;;  %s3118_s5 = inlined_call_operand.vmem [shape: f32[1,64], index: 5, kind: input, shape index: {}]   ;;  %s3119_s6 = inlined_call_operand.vmem [shape: bf16[32,256], index: 6, kind: input, shape index: {}]   ;;  %s3120_s7 = inlined_call_operand.vmem [shape: f32[1,256], index: 7, kind: input, shape index: {}]   ;;  %s3121_s8 = inlined_call_operand.hbm [shape: bf16[256,896], index: 8, kind: input, shape index: {}]   ;;  %s3122_s9 = inlined_call_operand.vmem [shape: f32[1,896], index: 9, kind: input, shape index: {}]   ;;  %s3123_s10 = inlined_call_operand.hbm [shape: f32[8,896], index: 10, kind: output, shape index: {0}]   ;;  %s3124_s11 = inlined_call_operand.hbm [shape: f32[8,64], index: 11, kind: output, shape index: {1}]  }
   0x1   :  { %18 = vsyncpa [#allocation6], 0 }
   0x2   :  { %19 = vsyncpa [#allocation4], 0 }
   0x3   :  { %20 = vsyncpa [#allocation9], 0  ;;  %s2859_s17 = smov [#allocation2]   ;;  %s2763_s21 = scalar_lea.hbm %s3115_s2, 12544 }
   0x4   :  { %s30_s18 = sshll.u32 %s2859_s17, 4  ;;  %p2764_p0 = scmp.ne.s32.totalorder %s3115_s2, %s2763_s21  ;;  %s31_s18 = int_to_ptr.vmem [resolvable:$true] %s30_s18 }
   0x5   :  { %p2767_p1 = scmp.lt.u32.totalorder %s2763_s21, %s3115_s2 }
   0x7   :  { %p2769_p2 = pnand %p2767_p1, %p2764_p0 }
   0x9   :  { %2772 = shalt.err (!%p2769_p2)
}
   0xa   :  { %s2773_s26 = scalar_lea.vmem %s31_s18, 12544  ;;  %p2778_p4 = scmp.lt.s32.totalorder %s31_s18, %s31_s18 }
   0xb   :  { %p2774_p3 = scmp.ne.s32.totalorder %s31_s18, %s2773_s26  ;;  %p2779_p5 = scmp.lt.s32.totalorder %s2773_s26, %s2773_s26 }
   0xd   :  { %p2780_p6 = por %p2779_p5, %p2778_p4 }
   0xf   :  { %p2781_p7 = pnand %p2780_p6, %p2774_p3 }
  0x11   :  { %2784 = shalt.err (!%p2781_p7)
}
  0x12   :  { %s2860_s27 = smov 128   ;;  %s2861_s28 = smov 8  }
  0x13   :  { %36 = dma.hbm_to_vmem [thread:$0]  %s3115_s2, 12544, %s31_s18, [#allocation3], %s2860_s27, %s2860_s27, %s2861_s28  }
  0x14   :  { %s2862_s12 = smov [#allocation5]   ;;  %s2785_s16 = scalar_lea.hbm %s3121_s8, 14336 }
  0x15   :  { %s52_s13 = sshll.u32 %s2862_s12, 4  ;;  %p2786_p8 = scmp.ne.s32.totalorder %s3121_s8, %s2785_s16  ;;  %s53_s13 = int_to_ptr.vmem [resolvable:$true] %s52_s13 }
  0x16   :  { %p2789_p9 = scmp.lt.u32.totalorder %s2785_s16, %s3121_s8 }
  0x18   :  { %p2791_p10 = pnand %p2789_p9, %p2786_p8 }
  0x1a   :  { %2794 = shalt.err (!%p2791_p10)
}
  0x1b   :  { %s2795_s22 = scalar_lea.vmem %s53_s13, 14336  ;;  %p2800_p12 = scmp.lt.s32.totalorder %s53_s13, %s53_s13 }
  0x1c   :  { %p2796_p11 = scmp.ne.s32.totalorder %s53_s13, %s2795_s22  ;;  %p2801_p13 = scmp.lt.s32.totalorder %s2795_s22, %s2795_s22 }
  0x1e   :  { %p2802_p0 = por %p2801_p13, %p2800_p12 }
  0x20   :  { %p2803_p1 = pnand %p2802_p0, %p2796_p11 }
  0x22   :  { %2806 = shalt.err (!%p2803_p1)
}
  0x23   :  { %s2863_s2 = smov 448   ;;  %s2864_s18 = smov 28  }
  0x24   :  { %58 = dma.hbm_to_vmem [thread:$0]  %s3121_s8, 14336, %s53_s13, [#allocation6], %s2863_s2, %s2863_s2, %s2864_s18  }
  0x25   :  { %2851 = dma.done.wait [#allocation3], 12544  }
  0x26   :  { %2852 = vsyncadd [#allocation3], 4294954752 }
  0x27   :  { %2853 = dma.done.wait [#allocation6], 14336  }
  0x28   :  { %2854 = vsyncadd [#allocation6], 4294952960  ;;  %v2404_v0 = vld [vmem:[#allocation2 + $0x4] ss:$8 sps:$4 sm:$0xff]   ;;  %v2406_v1 = vld [vmem:[#allocation2] ss:$8 sps:$4 sm:$0xff]  }
  0x29   :  { %687 = vmatprep.subr.bf16.mxu0 %v2404_v0  ;;  %v2407_v2 = vld [vmem:[#allocation2 + $0x14] ss:$8 sps:$4 sm:$0xff]   ;;  %v2409_v3 = vld [vmem:[#allocation2 + $0x10] ss:$8 sps:$4 sm:$0xff]   ;;  %v2410_v4 = vld [vmem:[#allocation2 + $0x24] ss:$8 sps:$4 sm:$0xff]  }
  0x2a   :  { %688 = vmatpush1.bf16.msra.mxu0 %v2406_v1  ;;  %v2412_v5 = vld [vmem:[#allocation2 + $0x20] ss:$8 sps:$4 sm:$0xff]   ;;  %v2413_v6 = vld [vmem:[#allocation2 + $0x34] ss:$8 sps:$4 sm:$0xff]   ;;  %v2415_v7 = vld [vmem:[#allocation2 + $0x30] ss:$8 sps:$4 sm:$0xff]  }
  0x2b   :  { %689 = vmatprep.subr.bf16.mxu0 %v2407_v2  ;;  %v2416_v8 = vld [vmem:[#allocation2 + $0x44] ss:$8 sps:$4 sm:$0xff]   ;;  %v2418_v9 = vld [vmem:[#allocation2 + $0x40] ss:$8 sps:$4 sm:$0xff]   ;;  %v2419_v10 = vld [vmem:[#allocation2 + $0x54] ss:$8 sps:$4 sm:$0xff]  }
  0x2c   :  { %v2421_v11 = vld [vmem:[#allocation2 + $0x50] ss:$8 sps:$4 sm:$0xff]   ;;  %v2422_v12 = vld [vmem:[#allocation2 + $0x64] ss:$8 sps:$4 sm:$0xff]   ;;  %v2424_v15 = vld [vmem:[#allocation2 + $0x60] ss:$8 sps:$4 sm:$0xff]  }
  0x2d   :  { %v69_v13 = vld [vmem:[%s3113_s0 + $0x8] sm:$0xff]  ;;  %v2425_v16 = vld [vmem:[#allocation2 + $0x74] ss:$8 sps:$4 sm:$0xff]   ;;  %v2427_v17 = vld [vmem:[#allocation2 + $0x70] ss:$8 sps:$4 sm:$0xff]   ;;  %vm683_vm0 = vcmask 130048  }
  0x2e   :  { %690 = vmatpush1.bf16.msra.mxu0 %v2409_v3  ;;  %v77_v14 = vpack.c.bf16 %v69_v13, %v69_v13  ;;  %v2428_v18 = vld [vmem:[#allocation2 + $0x84] ss:$8 sps:$4 sm:$0xff]   ;;  %v2430_v19 = vld [vmem:[#allocation2 + $0x80] ss:$8 sps:$4 sm:$0xff]   ;;  %v2431_v20 = vld [vmem:[#allocation2 + $0x94] ss:$8 sps:$4 sm:$0xff]  }
  0x2f   :  { %691 = vmatprep.subr.bf16.mxu0 %v2410_v4  ;;  %v2433_v21 = vld [vmem:[#allocation2 + $0x90] ss:$8 sps:$4 sm:$0xff]   ;;  %v2434_v22 = vld [vmem:[#allocation2 + $0xa4] ss:$8 sps:$4 sm:$0xff]   ;;  %v2436_v23 = vld [vmem:[#allocation2 + $0xa0] ss:$8 sps:$4 sm:$0xff]  }
  0x30   :  { %719 = vmatprep.mubr.bf16.mxu0 %v77_v14  ;;  %v2437_v24 = vld [vmem:[#allocation2 + $0xb4] ss:$8 sps:$4 sm:$0xff]   ;;  %v2439_v25 = vld [vmem:[#allocation2 + $0xb0] ss:$8 sps:$4 sm:$0xff]   ;;  %v2440_v26 = vld [vmem:[#allocation2 + $0xc4] ss:$8 sps:$4 sm:$0xff]  }
  0x31   :  { %v2442_v27 = vld [vmem:[#allocation2 + $0xc0] ss:$8 sps:$4 sm:$0xff]   ;;  %v2443_v28 = vld [vmem:[#allocation2 + $0xd4] ss:$8 sps:$4 sm:$0xff]   ;;  %v2445_v29 = vld [vmem:[#allocation2 + $0xd0] ss:$8 sps:$4 sm:$0xff]  }
  0x32   :  { %692 = vmatpush1.bf16.msra.mxu0 %v2412_v5  ;;  %v2446_v30 = vld [vmem:[#allocation2 + $0xe4] ss:$8 sps:$4 sm:$0xff]   ;;  %v2448_v31 = vld [vmem:[#allocation2 + $0xe0] ss:$8 sps:$4 sm:$0xff]   ;;  %v2449_v32 = vld [vmem:[#allocation2 + $0xf4] ss:$8 sps:$4 sm:$0xff]  }
  0x33   :  { %693 = vmatprep.subr.bf16.mxu0 %v2413_v6  ;;  %v2451_v33 = vld [vmem:[#allocation2 + $0xf0] ss:$8 sps:$4 sm:$0xff]   ;;  %v2454_v34 = vld [vmem:[#allocation2 + $0x104] ss:$8 sps:$4 sm:$0xff]   ;;  %v2452_v38 = vld [vmem:[#allocation2 + $0x100] ss:$8 sps:$4 sm:$0xff]  }
  0x34   :  { %v68_v35 = vld [vmem:[%s3113_s0] sm:$0xff]  ;;  %v71_v36 = vld [vmem:[%s3113_s0 + $0x18] sm:$0xff]  ;;  %v2553_v49 = vld [vmem:[%s3117_s4 + $0x48] sm:$0xff]   ;;  %vm2071_vm1 = vcmask 523264   ;;  %vm1076_vm2 = vcmask 261120  }
  0x35   :  { %v76_v37 = vpack.c.bf16 %v68_v35, %v68_v35  ;;  %v79_v39 = vpack.c.bf16 %v71_v36, %v71_v36  ;;  %v2457_v40 = vld [vmem:[#allocation2 + $0x114] ss:$8 sps:$4 sm:$0xff]   ;;  %v2455_v41 = vld [vmem:[#allocation2 + $0x110] ss:$8 sps:$4 sm:$0xff]   ;;  %v2460_v42 = vld [vmem:[#allocation2 + $0x124] ss:$8 sps:$4 sm:$0xff]  }
  0x36   :  { %694 = vmatpush1.bf16.msra.mxu0 %v2415_v7  ;;  %v2458_v43 = vld [vmem:[#allocation2 + $0x120] ss:$8 sps:$4 sm:$0xff]   ;;  %v2463_v44 = vld [vmem:[#allocation2 + $0x134] ss:$8 sps:$4 sm:$0xff]   ;;  %v2461_v45 = vld [vmem:[#allocation2 + $0x130] ss:$8 sps:$4 sm:$0xff]  }
  0x37   :  { %695 = vmatprep.subr.bf16.mxu0 %v2416_v8  ;;  %v2466_v46 = vld [vmem:[#allocation2 + $0x144] ss:$8 sps:$4 sm:$0xff]   ;;  %v2464_v50 = vld [vmem:[#allocation2 + $0x140] ss:$8 sps:$4 sm:$0xff]   ;;  %v2469_v51 = vld [vmem:[#allocation2 + $0x154] ss:$8 sps:$4 sm:$0xff]  }
  0x38   :  { %v2551_v47 = vld [vmem:[%s3117_s4 + $0x40] sm:$0xff]   ;;  %v2467_v52 = vld [vmem:[#allocation2 + $0x150] ss:$8 sps:$4 sm:$0xff]   ;;  %v2554_v53 = vld [vmem:[%s3117_s4 + $0x8] sm:$0xff]  }
  0x39   :  { %v2552_v48 = vld [vmem:[%s3117_s4] sm:$0xff]   ;;  %2336 = vmatprep.subr.bf16.mxu1 %v2551_v47  ;;  %v2555_v55 = vld [vmem:[%s3117_s4 + $0x50] sm:$0xff]   ;;  %v2557_v57 = vld [vmem:[%s3117_s4 + $0x58] sm:$0xff]  }
  0x3a   :  { %696 = vmatpush1.bf16.msra.mxu0 %v2418_v9  ;;  %2337 = vmatpush3.bf16.msra.mxu1 %v2552_v48  ;;  %v2472_v54 = vld [vmem:[#allocation2 + $0x164] ss:$8 sps:$4 sm:$0xff]   ;;  %v2556_v56 = vld [vmem:[%s3117_s4 + $0x10] sm:$0xff]   ;;  %v2470_v58 = vld [vmem:[#allocation2 + $0x160] ss:$8 sps:$4 sm:$0xff]  }
  0x3b   :  { %697 = vmatprep.subr.bf16.mxu0 %v2419_v10  ;;  %2338 = vmatprep.subr.bf16.mxu1 %v2553_v49  ;;  %v2475_v59 = vld [vmem:[#allocation2 + $0x174] ss:$8 sps:$4 sm:$0xff]   ;;  %v2559_v61 = vld [vmem:[%s3117_s4 + $0x60] sm:$0xff]   ;;  %v2473_v62 = vld [vmem:[#allocation2 + $0x170] ss:$8 sps:$4 sm:$0xff]  }
  0x3c   :  { %v2558_v60 = vld [vmem:[%s3117_s4 + $0x18] sm:$0xff]   ;;  %v2478_v63 = vld [vmem:[#allocation2 + $0x184] ss:$8 sps:$4 sm:$0xff]   ;;  %v2476_v2 = vld [vmem:[#allocation2 + $0x180] ss:$8 sps:$4 sm:$0xff]  }
  0x3d   :  { %v2560_v0 = vld [vmem:[%s3117_s4 + $0x20] sm:$0xff]   ;;  %v2561_v1 = vld [vmem:[%s3117_s4 + $0x68] sm:$0xff]   ;;  %v2481_v3 = vld [vmem:[#allocation2 + $0x194] ss:$8 sps:$4 sm:$0xff]  }
  0x3e   :  { %698 = vmatpush1.bf16.msra.mxu0 %v2421_v11  ;;  %2339 = vmatpush3.bf16.msra.mxu1 %v2554_v53  ;;  %v2562_v4 = vld [vmem:[%s3117_s4 + $0x28] sm:$0xff]   ;;  %v2479_v5 = vld [vmem:[#allocation2 + $0x190] ss:$8 sps:$4 sm:$0xff]   ;;  %v2487_v8 = vld [vmem:[#allocation2 + $0x1b4] ss:$8 sps:$4 sm:$0xff]  }
  0x3f   :  { %699 = vmatprep.subr.bf16.mxu0 %v2422_v12  ;;  %2340 = vmatprep.subr.bf16.mxu1 %v2555_v55  ;;  %v2484_v6 = vld [vmem:[#allocation2 + $0x1a4] ss:$8 sps:$4 sm:$0xff]   ;;  %v2482_v7 = vld [vmem:[#allocation2 + $0x1a0] ss:$8 sps:$4 sm:$0xff]   ;;  %v2485_v9 = vld [vmem:[#allocation2 + $0x1b0] ss:$8 sps:$4 sm:$0xff]  }
  0x40   :  { %v2490_v10 = vld [vmem:[#allocation2 + $0x1c4] ss:$8 sps:$4 sm:$0xff]   ;;  %v2488_v11 = vld [vmem:[#allocation2 + $0x1c0] ss:$8 sps:$4 sm:$0xff]   ;;  %v2493_v12 = vld [vmem:[#allocation2 + $0x1d4] ss:$8 sps:$4 sm:$0xff]  }
  0x41   :  { %v2491_v13 = vld [vmem:[#allocation2 + $0x1d0] ss:$8 sps:$4 sm:$0xff]   ;;  %v2496_v14 = vld [vmem:[#allocation2 + $0x1e4] ss:$8 sps:$4 sm:$0xff]   ;;  %v2518_v35 = vld [vmem:[#allocation2 + $0x260] ss:$8 sps:$4 sm:$0xff]  }
  0x42   :  { %700 = vmatpush1.bf16.msra.mxu0 %v2424_v15  ;;  %2341 = vmatpush3.bf16.msra.mxu1 %v2556_v56  ;;  %v2494_v15 = vld [vmem:[#allocation2 + $0x1e0] ss:$8 sps:$4 sm:$0xff]   ;;  %v2523_v36 = vld [vmem:[#allocation2 + $0x274] ss:$8 sps:$4 sm:$0xff]   ;;  %v2539_v49 = vld [vmem:[#allocation2 + $0x2d0] ss:$8 sps:$4 sm:$0xff]  }
  0x43   :  { %701 = vmatprep.subr.bf16.mxu0 %v2425_v16  ;;  %2342 = vmatprep.subr.bf16.mxu1 %v2557_v57  ;;  %v2499_v16 = vld [vmem:[#allocation2 + $0x1f4] ss:$8 sps:$4 sm:$0xff]   ;;  %v2536_v47 = vld [vmem:[#allocation2 + $0x2c0] ss:$8 sps:$4 sm:$0xff]   ;;  %v2545_v53 = vld [vmem:[#allocation2 + $0x2f0] ss:$8 sps:$4 sm:$0xff]  }
  0x44   :  { %v2541_v48 = vld [vmem:[#allocation2 + $0x2d4] ss:$8 sps:$4 sm:$0xff]   ;;  %v2550_v55 = vld [vmem:[#allocation2 + $0x304] ss:$8 sps:$4 sm:$0xff]   ;;  %v2548_v57 = vld [vmem:[#allocation2 + $0x300] ss:$8 sps:$4 sm:$0xff]  }
  0x46   :  { %702 = vmatpush1.bf16.msra.mxu0 %v2427_v17  ;;  %2343 = vmatpush3.bf16.msra.mxu1 %v2558_v60  ;;  %v2497_v17 = vld [vmem:[#allocation2 + $0x1f0] ss:$8 sps:$4 sm:$0xff]  }
  0x47   :  { %703 = vmatprep.subr.bf16.mxu0 %v2428_v18  ;;  %2344 = vmatprep.subr.bf16.mxu1 %v2559_v61  ;;  %v70_v18 = vld [vmem:[%s3113_s0 + $0x10] sm:$0xff] }
  0x48   :  { %v2563_v61 = vld [vmem:[%s3117_s4 + $0x70] sm:$0xff]  }
  0x4a   :  { %704 = vmatpush1.bf16.msra.mxu0 %v2430_v19  ;;  %2345 = vmatpush3.bf16.msra.mxu1 %v2560_v0  ;;  %v2502_v19 = vld [vmem:[#allocation2 + $0x204] ss:$8 sps:$4 sm:$0xff]   ;;  %v2566_v0 = vld [vmem:[%s3117_s4 + $0x38] sm:$0xff]  }
  0x4b   :  { %705 = vmatprep.subr.bf16.mxu0 %v2431_v20  ;;  %2346 = vmatprep.subr.bf16.mxu1 %v2561_v1  ;;  %v73_v20 = vld [vmem:[%s3113_s0 + $0x28] sm:$0xff]  ;;  %v183_v1 = vlaneseq }
  0x4e   :  { %706 = vmatpush1.bf16.msra.mxu0 %v2433_v21  ;;  %2347 = vmatpush3.bf16.msra.mxu1 %v2562_v4  ;;  %v78_v21 = vpack.c.bf16 %v70_v18, %v70_v18  ;;  %v181_v4 = vld [vmem:[%s3116_s3] sm:$0x3] }
  0x4f   :  { %707 = vmatprep.subr.bf16.mxu0 %v2434_v22  ;;  %v2500_v22 = vld [vmem:[#allocation2 + $0x200] ss:$8 sps:$4 sm:$0xff]   ;;  %2348 = vmatprep.subr.bf16.mxu1 %v2563_v61 }
  0x50   :  { %v2567_v18 = vld [vmem:[%s3119_s6] ss:$8 sps:$4 sm:$0xff]  }
  0x51   :  { %v2593_v61 = vld [vmem:[#allocation5 + $0x154] ss:$28 sps:$4 sm:$0xff]  }
  0x52   :  { %708 = vmatpush1.bf16.msra.mxu0 %v2436_v23  ;;  %v81_v23 = vpack.c.bf16 %v73_v20, %v73_v20 }
  0x53   :  { %709 = vmatprep.subr.bf16.mxu0 %v2437_v24  ;;  %v2505_v24 = vld [vmem:[#allocation2 + $0x214] ss:$8 sps:$4 sm:$0xff]  }
  0x56   :  { %710 = vmatpush1.bf16.msra.mxu0 %v2439_v25  ;;  %v2503_v25 = vld [vmem:[#allocation2 + $0x210] ss:$8 sps:$4 sm:$0xff]  }
  0x57   :  { %711 = vmatprep.subr.bf16.mxu0 %v2440_v26  ;;  %v2508_v26 = vld [vmem:[#allocation2 + $0x224] ss:$8 sps:$4 sm:$0xff]  }
  0x5a   :  { %712 = vmatpush1.bf16.msra.mxu0 %v2442_v27  ;;  %v2506_v27 = vld [vmem:[#allocation2 + $0x220] ss:$8 sps:$4 sm:$0xff]  }
  0x5b   :  { %713 = vmatprep.subr.bf16.mxu0 %v2443_v28  ;;  %v2511_v28 = vld [vmem:[#allocation2 + $0x234] ss:$8 sps:$4 sm:$0xff]  }
  0x5e   :  { %714 = vmatpush1.bf16.msra.mxu0 %v2445_v29  ;;  %v2509_v29 = vld [vmem:[#allocation2 + $0x230] ss:$8 sps:$4 sm:$0xff]  }
  0x5f   :  { %715 = vmatprep.subr.bf16.mxu0 %v2446_v30  ;;  %v2514_v30 = vld [vmem:[#allocation2 + $0x244] ss:$8 sps:$4 sm:$0xff]  }
  0x62   :  { %716 = vmatpush1.bf16.msra.mxu0 %v2448_v31  ;;  %v2512_v31 = vld [vmem:[#allocation2 + $0x240] ss:$8 sps:$4 sm:$0xff]  }
  0x63   :  { %717 = vmatprep.subr.bf16.mxu0 %v2449_v32  ;;  %v2517_v32 = vld [vmem:[#allocation2 + $0x254] ss:$8 sps:$4 sm:$0xff]  }
  0x66   :  { %718 = vmatpush1.bf16.msra.mxu0 %v2451_v33  ;;  %v2515_v33 = vld [vmem:[#allocation2 + $0x250] ss:$8 sps:$4 sm:$0xff]  }
  0x67   :  { %728 = vmatprep.subr.bf16.mxu0 %v2454_v34  ;;  %v2520_v34 = vld [vmem:[#allocation2 + $0x264] ss:$8 sps:$4 sm:$0xff]  }
  0x69   :  { %720 = vmatmul.mubr.bf16.vlgmr.msra.gmra.mrb[0].mxu0 %v76_v37  ;;  %v2521_v37 = vld [vmem:[#allocation2 + $0x270] ss:$8 sps:$4 sm:$0xff]  }
  0x6a   :  { %729 = vmatpush1.bf16.msra.mxu0 %v2452_v38  ;;  %760 = vmatprep.mubr.bf16.mxu0 %v79_v39  ;;  %v2526_v38 = vld [vmem:[#allocation2 + $0x284] ss:$8 sps:$4 sm:$0xff]   ;;  %v2524_v39 = vld [vmem:[#allocation2 + $0x280] ss:$8 sps:$4 sm:$0xff]  }
  0x6b   :  { %730 = vmatprep.subr.bf16.mxu0 %v2457_v40  ;;  %v2529_v40 = vld [vmem:[#allocation2 + $0x294] ss:$8 sps:$4 sm:$0xff]  }
  0x6e   :  { %731 = vmatpush1.bf16.msra.mxu0 %v2455_v41  ;;  %v2527_v41 = vld [vmem:[#allocation2 + $0x290] ss:$8 sps:$4 sm:$0xff]  }
  0x6f   :  { %732 = vmatprep.subr.bf16.mxu0 %v2460_v42  ;;  %v2532_v42 = vld [vmem:[#allocation2 + $0x2a4] ss:$8 sps:$4 sm:$0xff]  }
  0x72   :  { %733 = vmatpush1.bf16.msra.mxu0 %v2458_v43  ;;  %v2530_v43 = vld [vmem:[#allocation2 + $0x2a0] ss:$8 sps:$4 sm:$0xff]  }
  0x73   :  { %734 = vmatprep.subr.bf16.mxu0 %v2463_v44  ;;  %v2535_v44 = vld [vmem:[#allocation2 + $0x2b4] ss:$8 sps:$4 sm:$0xff]  }
  0x76   :  { %735 = vmatpush1.bf16.msra.mxu0 %v2461_v45  ;;  %v2533_v45 = vld [vmem:[#allocation2 + $0x2b0] ss:$8 sps:$4 sm:$0xff]  }
  0x77   :  { %736 = vmatprep.subr.bf16.mxu0 %v2466_v46  ;;  %v2538_v46 = vld [vmem:[#allocation2 + $0x2c4] ss:$8 sps:$4 sm:$0xff]  }
  0x7a   :  { %737 = vmatpush1.bf16.msra.mxu0 %v2464_v50  ;;  %v2544_v50 = vld [vmem:[#allocation2 + $0x2e4] ss:$8 sps:$4 sm:$0xff]  }
  0x7b   :  { %738 = vmatprep.subr.bf16.mxu0 %v2469_v51  ;;  %v2542_v51 = vld [vmem:[#allocation2 + $0x2e0] ss:$8 sps:$4 sm:$0xff]  }
  0x7e   :  { %739 = vmatpush1.bf16.msra.mxu0 %v2467_v52  ;;  %v2547_v52 = vld [vmem:[#allocation2 + $0x2f4] ss:$8 sps:$4 sm:$0xff]  }
  0x7f   :  { %740 = vmatprep.subr.bf16.mxu0 %v2472_v54  ;;  %v72_v54 = vld [vmem:[%s3113_s0 + $0x20] sm:$0xff] }
  0x80   :  { %v80_v56 = vpack.c.bf16 %v72_v54, %v72_v54  ;;  %v2579_v54 = vld [vmem:[#allocation5 + $0x70] ss:$28 sps:$4 sm:$0xff]  }
  0x82   :  { %741 = vmatpush1.bf16.msra.mxu0 %v2470_v58  ;;  %v2865_v58 = vmov 0  }
  0x83   :  { %742 = vmatprep.subr.bf16.mxu0 %v2475_v59  ;;  %v74_v59 = vld [vmem:[%s3113_s0 + $0x30] sm:$0xff] }
  0x84   :  { %v82_v60 = vpack.c.bf16 %v74_v59, %v74_v59  ;;  %v2590_v59 = vld [vmem:[#allocation5 + $0x11c] ss:$28 sps:$4 sm:$0xff]  }
  0x86   :  { %743 = vmatpush1.bf16.msra.mxu0 %v2473_v62  ;;  %v2564_v62 = vld [vmem:[%s3117_s4 + $0x30] sm:$0xff]  }
  0x87   :  { %744 = vmatprep.subr.bf16.mxu0 %v2478_v63  ;;  %2349 = vmatpush3.bf16.msra.mxu1 %v2564_v62  ;;  %v2565_v63 = vld [vmem:[%s3117_s4 + $0x78] sm:$0xff]  }
  0x88   :  { %2350 = vmatprep.subr.bf16.mxu1 %v2565_v63  ;;  %v2591_v62 = vld [vmem:[#allocation5 + $0x150] ss:$28 sps:$4 sm:$0xff]  }
  0x89   :  { %v2596_v63 = vld [vmem:[#allocation5 + $0x18c] ss:$28 sps:$4 sm:$0xff]  }
  0x8a   :  { %745 = vmatpush1.bf16.msra.mxu0 %v2476_v2  ;;  %v3022_v2 = vshrl.u32 %v183_v1, 7  ;;  %v2599_v1 = vld [vmem:[#allocation5 + $0x1c4] ss:$28 sps:$4 sm:$0xff]  }
  0x8b   :  { %746 = vmatprep.subr.bf16.mxu0 %v2481_v3  ;;  %2351 = vmatpush3.bf16.msra.mxu1 %v2566_v0  ;;  %v2594_v0 = vld [vmem:[#allocation5 + $0x188] ss:$28 sps:$4 sm:$0xff]  }
  0x8c   :  { %v3025_v3 = vsub.s32 0, %v3022_v2 }
  0x8e   :  { %747 = vmatpush1.bf16.msra.mxu0 %v2479_v5  ;;  %v3031_v5 = vsub.s32 1, %v3022_v2 }
  0x8f   :  { %748 = vmatprep.subr.bf16.mxu0 %v2484_v6  ;;  %v186_v6 = vrot.slane %v181_v4, %v3025_v3 }
  0x92   :  { %749 = vmatpush1.bf16.msra.mxu0 %v2482_v7  ;;  %v190_v7 = vrot.slane %v181_v4, %v3031_v5  ;;  %v2597_v4 = vld [vmem:[#allocation5 + $0x1c0] ss:$28 sps:$4 sm:$0xff]  }
  0x93   :  { %750 = vmatprep.subr.bf16.mxu0 %v2487_v8 }
  0x96   :  { %751 = vmatpush1.bf16.msra.mxu0 %v2485_v9 }
  0x97   :  { %752 = vmatprep.subr.bf16.mxu0 %v2490_v10 }
  0x9a   :  { %753 = vmatpush1.bf16.msra.mxu0 %v2488_v11 }
  0x9b   :  { %754 = vmatprep.subr.bf16.mxu0 %v2493_v12 }
  0x9e   :  { %755 = vmatpush1.bf16.msra.mxu0 %v2491_v13 }
  0x9f   :  { %756 = vmatprep.subr.bf16.mxu0 %v2496_v14 }
  0xa2   :  { %757 = vmatpush1.bf16.msra.mxu0 %v2494_v15 }
  0xa3   :  { %758 = vmatprep.subr.bf16.mxu0 %v2499_v16 }
  0xa6   :  { %759 = vmatpush1.bf16.msra.mxu0 %v2497_v17 }
  0xa7   :  { %769 = vmatprep.subr.bf16.mxu0 %v2502_v19  ;;  %v2569_v19 = vld [vmem:[%s3119_s6 + $0x4] ss:$8 sps:$4 sm:$0xff]  }
  0xa8   :  { %1080 = vmatprep.subr.bf16.mxu1 %v2569_v19  ;;  %v2631_v19 = vld [vmem:[#allocation5 + $0x168] ss:$28 sps:$4 sm:$0xff]  }
  0xa9   :  { %761 = vmatmul.mubr.bf16.vlgmr.msra.gmra.mrb[0].mxu0 %v78_v21  ;;  %v2202_v21 = vld [vmem:[%s3118_s5] ss:$0 sm:$0xff]  ;;  %s2866_s5 = smov 96  }
  0xaa   :  { %770 = vmatpush1.bf16.msra.mxu0 %v2500_v22  ;;  %801 = vmatprep.mubr.bf16.mxu0 %v81_v23 }
  0xab   :  { %771 = vmatprep.subr.bf16.mxu0 %v2505_v24 }
  0xae   :  { %772 = vmatpush1.bf16.msra.mxu0 %v2503_v25 }
  0xaf   :  { %773 = vmatprep.subr.bf16.mxu0 %v2508_v26 }
  0xb2   :  { %774 = vmatpush1.bf16.msra.mxu0 %v2506_v27 }
  0xb3   :  { %775 = vmatprep.subr.bf16.mxu0 %v2511_v28 }
  0xb6   :  { %776 = vmatpush1.bf16.msra.mxu0 %v2509_v29  ;;  %v2572_v29 = vld [vmem:[%s3119_s6 + $0x14] ss:$8 sps:$4 sm:$0xff]  }
  0xb7   :  { %777 = vmatprep.subr.bf16.mxu0 %v2514_v30  ;;  %v2570_v30 = vld [vmem:[%s3119_s6 + $0x10] ss:$8 sps:$4 sm:$0xff]  }
  0xba   :  { %778 = vmatpush1.bf16.msra.mxu0 %v2512_v31  ;;  %v2575_v31 = vld [vmem:[#allocation5 + $0x4] ss:$28 sps:$4 sm:$0xff]  }
  0xbb   :  { %779 = vmatprep.subr.bf16.mxu0 %v2517_v32 }
  0xbe   :  { %780 = vmatpush1.bf16.msra.mxu0 %v2515_v33  ;;  %v2600_v33 = vld [vmem:[#allocation5 + $0x1d8] ss:$28 sps:$4 sm:$0xff]  }
  0xbf   :  { %781 = vmatprep.subr.bf16.mxu0 %v2520_v34  ;;  %v2601_v34 = vld [vmem:[#allocation5 + $0x18] ss:$28 sps:$4 sm:$0xff]  }
  0xc2   :  { %782 = vmatpush1.bf16.msra.mxu0 %v2518_v35  ;;  %v2605_v35 = vld [vmem:[#allocation5 + $0x210] ss:$28 sps:$4 sm:$0xff]  }
  0xc3   :  { %783 = vmatprep.subr.bf16.mxu0 %v2523_v36  ;;  %v2606_v36 = vld [vmem:[#allocation5 + $0x50] ss:$28 sps:$4 sm:$0xff]  }
  0xc6   :  { %784 = vmatpush1.bf16.msra.mxu0 %v2521_v37  ;;  %v2610_v37 = vld [vmem:[#allocation5 + $0x248] ss:$28 sps:$4 sm:$0xff]  }
  0xc7   :  { %785 = vmatprep.subr.bf16.mxu0 %v2526_v38  ;;  %v2611_v38 = vld [vmem:[#allocation5 + $0x88] ss:$28 sps:$4 sm:$0xff]  }
  0xca   :  { %786 = vmatpush1.bf16.msra.mxu0 %v2524_v39  ;;  %v2615_v39 = vld [vmem:[#allocation5 + $0x280] ss:$28 sps:$4 sm:$0xff]  }
  0xcb   :  { %787 = vmatprep.subr.bf16.mxu0 %v2529_v40  ;;  %v2616_v40 = vld [vmem:[#allocation5 + $0xc0] ss:$28 sps:$4 sm:$0xff]  }
  0xce   :  { %788 = vmatpush1.bf16.msra.mxu0 %v2527_v41  ;;  %v2620_v41 = vld [vmem:[#allocation5 + $0x2b8] ss:$28 sps:$4 sm:$0xff]  }
  0xcf   :  { %789 = vmatprep.subr.bf16.mxu0 %v2532_v42  ;;  %v2621_v42 = vld [vmem:[#allocation5 + $0xf8] ss:$28 sps:$4 sm:$0xff]  }
  0xd2   :  { %790 = vmatpush1.bf16.msra.mxu0 %v2530_v43  ;;  %v2625_v43 = vld [vmem:[#allocation5 + $0x2f0] ss:$28 sps:$4 sm:$0xff]  }
  0xd3   :  { %791 = vmatprep.subr.bf16.mxu0 %v2535_v44  ;;  %v2626_v44 = vld [vmem:[#allocation5 + $0x130] ss:$28 sps:$4 sm:$0xff]  }
  0xd6   :  { %792 = vmatpush1.bf16.msra.mxu0 %v2533_v45  ;;  %v75_v45 = vld [vmem:[%s3114_s1] sm:$0xff] }
  0xd7   :  { %793 = vmatprep.subr.bf16.mxu0 %v2538_v46 }
  0xda   :  { %794 = vmatpush1.bf16.msra.mxu0 %v2536_v47 }
  0xdb   :  { %795 = vmatprep.subr.bf16.mxu0 %v2541_v48 }
  0xde   :  { %796 = vmatpush1.bf16.msra.mxu0 %v2539_v49  ;;  %v2573_v49 = vld [vmem:[#allocation5] ss:$28 sps:$4 sm:$0xff]  }
  0xdf   :  { %797 = vmatprep.subr.bf16.mxu0 %v2544_v50 }
  0xe2   :  { %798 = vmatpush1.bf16.msra.mxu0 %v2542_v51  ;;  %v2578_v51 = vld [vmem:[#allocation5 + $0x3c] ss:$28 sps:$4 sm:$0xff]  }
  0xe3   :  { %799 = vmatprep.subr.bf16.mxu0 %v2547_v52  ;;  %v2576_v52 = vld [vmem:[#allocation5 + $0x38] ss:$28 sps:$4 sm:$0xff]  }
  0xe6   :  { %800 = vmatpush1.bf16.msra.mxu0 %v2545_v53  ;;  %v2581_v53 = vld [vmem:[#allocation5 + $0x74] ss:$28 sps:$4 sm:$0xff]  }
  0xe7   :  { %810 = vmatprep.subr.bf16.mxu0 %v2550_v55  ;;  %v2584_v55 = vld [vmem:[#allocation5 + $0xac] ss:$28 sps:$4 sm:$0xff]  }
  0xe9   :  { %802 = vmatmul.mubr.bf16.vlgmr.msra.gmra.mrb[0].mxu0 %v80_v56  ;;  %v2582_v56 = vld [vmem:[#allocation5 + $0xa8] ss:$28 sps:$4 sm:$0xff]  }
  0xea   :  { %811 = vmatpush1.bf16.msra.mxu0 %v2548_v57  ;;  %842 = vmatprep.mubr.bf16.mxu0 %v2865_v58  ;;  %v2587_v57 = vld [vmem:[#allocation5 + $0xe4] ss:$28 sps:$4 sm:$0xff]  }
  0xeb   :  { %2358 = vmatprep.subr.bf16.mxu0 %v2600_v33 }
  0xf5   :  { %2201 = vmatmul.mubr.msk.bf16.vlgmr.msra.gmra.mrb[0].mxu0 %vm683_vm0, %v82_v60  ;;  %v2588_v60 = vld [vmem:[#allocation5 + $0x118] ss:$28 sps:$4 sm:$0xff]  }
  0xf6   :  { %2359 = vmatpush3.bf16.msra.mxu0 %v2601_v34 }
  0xf7   :  { %2360 = vmatprep.subr.bf16.mxu0 %v2605_v35 }
  0xfa   :  { %2361 = vmatpush3.bf16.msra.mxu0 %v2606_v36 }
  0xfb   :  { %2362 = vmatprep.subr.bf16.mxu0 %v2610_v37  ;;  %v2637_v37 = vld [vmem:[#allocation5 + $0x8] ss:$28 sps:$4 sm:$0xff]  }
  0xfe   :  { %2363 = vmatpush3.bf16.msra.mxu0 %v2611_v38 }
  0xff   :  { %2364 = vmatprep.subr.bf16.mxu0 %v2615_v39  ;;  %v2642_v39 = vld [vmem:[#allocation5 + $0x44] ss:$28 sps:$4 sm:$0xff]  }
 0x102   :  { %2365 = vmatpush3.bf16.msra.mxu0 %v2616_v40  ;;  %v2640_v40 = vld [vmem:[#allocation5 + $0x40] ss:$28 sps:$4 sm:$0xff]  }
 0x103   :  { %2366 = vmatprep.subr.bf16.mxu0 %v2620_v41  ;;  %v2645_v41 = vld [vmem:[#allocation5 + $0x7c] ss:$28 sps:$4 sm:$0xff]  }
 0x106   :  { %2367 = vmatpush3.bf16.msra.mxu0 %v2621_v42  ;;  %v2643_v42 = vld [vmem:[#allocation5 + $0x78] ss:$28 sps:$4 sm:$0xff]  }
 0x107   :  { %2368 = vmatprep.subr.bf16.mxu0 %v2625_v43  ;;  %v2648_v43 = vld [vmem:[#allocation5 + $0xb4] ss:$28 sps:$4 sm:$0xff]  }
 0x10a   :  { %2369 = vmatpush3.bf16.msra.mxu0 %v2626_v44  ;;  %v2646_v44 = vld [vmem:[#allocation5 + $0xb0] ss:$28 sps:$4 sm:$0xff]  }
 0x1c8   :  { %v844_v8 = vpop.f32.mrb[0].mxu0 }
 0x1c9   :  { %v2380_v9 = vadd.f32 %v844_v8, %v186_v6  ;;  %v846_v10 = vpop.f32.mrb[1].mxu0  ;;  %v2604_v6 = vld [vmem:[#allocation5 + $0x1fc] ss:$28 sps:$4 sm:$0xff]   ;;  %v2609_v8 = vld [vmem:[#allocation5 + $0x234] ss:$28 sps:$4 sm:$0xff]  }
 0x1ca   :  { %v2381_v11 = vadd.f32 %v846_v10, %v190_v7  ;;  %v848_v12 = vpop.f32.mrb[2].mxu0  ;;  %v2602_v7 = vld [vmem:[#allocation5 + $0x1f8] ss:$28 sps:$4 sm:$0xff]   ;;  %v2614_v10 = vld [vmem:[#allocation5 + $0x26c] ss:$28 sps:$4 sm:$0xff]  }
 0x1cb   :  { %v851_v13 = vmax.f32 %v2380_v9, 0.0  ;;  %v849_v14 = vpop.f32.mrb[3].mxu0  ;;  %v2607_v9 = vld [vmem:[#allocation5 + $0x230] ss:$28 sps:$4 sm:$0xff]   ;;  %v2619_v12 = vld [vmem:[#allocation5 + $0x2a4] ss:$28 sps:$4 sm:$0xff]  }
 0x1cc   :  { %v852_v15 = vmax.f32 %v2381_v11, 0.0  ;;  %v2612_v11 = vld [vmem:[#allocation5 + $0x268] ss:$28 sps:$4 sm:$0xff]   ;;  %v2624_v14 = vld [vmem:[#allocation5 + $0x2dc] ss:$28 sps:$4 sm:$0xff]  }
 0x1cd   :  { %v853_v17 = vpack.c.bf16 %v851_v13, %v851_v13  ;;  %v2617_v13 = vld [vmem:[#allocation5 + $0x2a0] ss:$28 sps:$4 sm:$0xff]  }
 0x1ce   :  { %v854_v16 = vpack.c.bf16 %v852_v15, %v852_v15  ;;  %v2622_v15 = vld [vmem:[#allocation5 + $0x2d8] ss:$28 sps:$4 sm:$0xff]  }
 0x1d0   :  { %1022 = vmatprep.mubr.bf16.mxu1 %v854_v16  ;;  %v2629_v16 = vld [vmem:[#allocation5 + $0x314] ss:$28 sps:$4 sm:$0xff]  }
 0x1d1   :  { %1023 = vmatmul.mubr.bf16.vlgmr.msra.gmra.mrb[0].mxu1 %v853_v17  ;;  %v2627_v17 = vld [vmem:[#allocation5 + $0x310] ss:$28 sps:$4 sm:$0xff]  }
 0x1d2   :  { %1112 = vmatprep.mubr.bf16.mxu1 %v2865_v58  ;;  %1081 = vmatpush1.bf16.msra.mxu1 %v2567_v18  ;;  %v2585_v58 = vld [vmem:[#allocation5 + $0xe0] ss:$28 sps:$4 sm:$0xff]   ;;  %v2630_v18 = vld [vmem:[#allocation5 + $0x328] ss:$28 sps:$4 sm:$0xff]  }
 0x1d3   :  { %1082 = vmatprep.subr.bf16.mxu1 %v2572_v29  ;;  %2370 = vmatprep.subr.bf16.mxu0 %v2630_v18  ;;  %v2702_v18 = vld [vmem:[#allocation5 + $0x12c] ss:$28 sps:$4 sm:$0xff]  }
 0x1d4   :  { %2371 = vmatpush3.bf16.msra.mxu0 %v2631_v19  ;;  %v2700_v19 = vld [vmem:[#allocation5 + $0x128] ss:$28 sps:$4 sm:$0xff]  }
 0x1d6   :  { %1083 = vmatpush1.bf16.msra.mxu1 %v2570_v30 }
 0x1d7   :  { %1866 = vmatprep.subr.bf16.mxu1 %v2575_v31 }
 0x2a4   :  { %v2352_v20 = vpop.f32.mrb[0].mxu1 }
 0x2a5   :  { %v2353_v22 = vpop.f32.mrb[1].mxu1 }
 0x2a6   :  { %v2354_v23 = vadd.f32 %v2353_v22, %v2352_v20  ;;  %v2355_v24 = vpop.f32.mrb[2].mxu1  ;;  %v2634_v20 = vld [vmem:[#allocation5 + $0x34c] ss:$28 sps:$4 sm:$0xff]   ;;  %v2635_v22 = vld [vmem:[#allocation5 + $0x360] ss:$28 sps:$4 sm:$0xff]  }
 0x2a7   :  { %v2356_v25 = vpop.f32.mrb[3].mxu1  ;;  %2372 = vmatprep.subr.bf16.mxu0 %v2635_v22  ;;  %v2639_v24 = vld [vmem:[#allocation5 + $0xc] ss:$28 sps:$4 sm:$0xff]   ;;  %v2708_v22 = vld [vmem:[#allocation5 + $0x19c] ss:$28 sps:$4 sm:$0xff]  }
 0x2a8   :  { %v1025_v26 = vadd.f32 %v2354_v23, %v2202_v21  ;;  %v2632_v21 = vld [vmem:[#allocation5 + $0x348] ss:$28 sps:$4 sm:$0xff]   ;;  %v2636_v23 = vld [vmem:[#allocation5 + $0x1a0] ss:$28 sps:$4 sm:$0xff]   ;;  %v1044_v25 = vld [vmem:[%s3120_s7] sm:$0x3] }
 0x2a9   :  { %2373 = vmatpush3.bf16.msra.mxu0 %v2636_v23  ;;  %v2706_v23 = vld [vmem:[#allocation5 + $0x198] ss:$28 sps:$4 sm:$0xff]  }
 0x2aa   :  { %v1030_v27 = vmul.f32 0.5, %v1025_v26  ;;  %2072 = vst.msk [vmem:[#allocation8] sm:$0xff] %vm2071_vm1, %v1025_v26 }
 0x2ac   :  { %v1031_v28 = vmul.f32 1.442695, %v1030_v27  ;;  %v1053_v27 = vrot.slane %v1044_v25, %v3031_v5 }
 0x2ae   :  { %2733 = vpow2.f32 %v1031_v28 }
 0x2b8   :  { %v2734_v32 = vpop.eup %2733 }
 0x2b9   :  { %1034 = vrot.lane.b32.xlu0 %v2734_v32, %s2866_s5 }
 0x32b   :  { %v1035_v46 = vpop.permute.xlu0 %1034 }
 0x32c   :  { %v1037_v47 = vmul.f32 %v1035_v46, %v75_v45  ;;  %v2651_v45 = vld [vmem:[#allocation5 + $0xec] ss:$28 sps:$4 sm:$0xff]  }
 0x32d   :  { %v2649_v46 = vld [vmem:[#allocation5 + $0xe8] ss:$28 sps:$4 sm:$0xff]  }
 0x32e   :  { %v1038_v48 = vadd.f32 %v1037_v47, %v1025_v26  ;;  %v1049_v26 = vrot.slane %v1044_v25, %v3025_v3  ;;  %v2654_v47 = vld [vmem:[#allocation5 + $0x124] ss:$28 sps:$4 sm:$0xff]   ;;  %v2709_v25 = vld [vmem:[#allocation5 + $0x1d0] ss:$28 sps:$4 sm:$0xff]  }
 0x330   :  { %v1039_v50 = vpack.c.bf16 %v1038_v48, %v1038_v48  ;;  %v2652_v48 = vld [vmem:[#allocation5 + $0x120] ss:$28 sps:$4 sm:$0xff]  }
 0x332   :  { %2223 = vmatmul.mubr.msk.bf16.vlgmr.msra.gmra.mrb[4].mxu1 %vm1076_vm2, %v1039_v50  ;;  %v2655_v50 = vld [vmem:[#allocation5 + $0x158] ss:$28 sps:$4 sm:$0xff]  }
 0x333   :  { %1867 = vmatpush1.bf16.msra.mxu1 %v2573_v49  ;;  %v2657_v49 = vld [vmem:[#allocation5 + $0x15c] ss:$28 sps:$4 sm:$0xff]  }
 0x334   :  { %1868 = vmatprep.subr.bf16.mxu1 %v2578_v51  ;;  %v2660_v51 = vld [vmem:[#allocation5 + $0x194] ss:$28 sps:$4 sm:$0xff]  }
 0x337   :  { %1869 = vmatpush1.bf16.msra.mxu1 %v2576_v52  ;;  %v2658_v52 = vld [vmem:[#allocation5 + $0x190] ss:$28 sps:$4 sm:$0xff]  }
 0x338   :  { %1870 = vmatprep.subr.bf16.mxu1 %v2581_v53  ;;  %v2663_v53 = vld [vmem:[#allocation5 + $0x1cc] ss:$28 sps:$4 sm:$0xff]  }
 0x33b   :  { %1871 = vmatpush1.bf16.msra.mxu1 %v2579_v54  ;;  %v2661_v54 = vld [vmem:[#allocation5 + $0x1c8] ss:$28 sps:$4 sm:$0xff]  }
 0x33c   :  { %1872 = vmatprep.subr.bf16.mxu1 %v2584_v55  ;;  %v2666_v55 = vld [vmem:[#allocation5 + $0x204] ss:$28 sps:$4 sm:$0xff]  }
 0x33f   :  { %1873 = vmatpush1.bf16.msra.mxu1 %v2582_v56  ;;  %v2664_v56 = vld [vmem:[#allocation5 + $0x200] ss:$28 sps:$4 sm:$0xff]  }
 0x340   :  { %1874 = vmatprep.subr.bf16.mxu1 %v2587_v57  ;;  %v2669_v57 = vld [vmem:[#allocation5 + $0x23c] ss:$28 sps:$4 sm:$0xff]  }
 0x343   :  { %1875 = vmatpush1.bf16.msra.mxu1 %v2585_v58  ;;  %v2667_v58 = vld [vmem:[#allocation5 + $0x238] ss:$28 sps:$4 sm:$0xff]  }
 0x344   :  { %1876 = vmatprep.subr.bf16.mxu1 %v2590_v59  ;;  %v2672_v59 = vld [vmem:[#allocation5 + $0x274] ss:$28 sps:$4 sm:$0xff]  }
 0x347   :  { %1877 = vmatpush1.bf16.msra.mxu1 %v2588_v60  ;;  %v2670_v60 = vld [vmem:[#allocation5 + $0x270] ss:$28 sps:$4 sm:$0xff]  }
 0x348   :  { %1878 = vmatprep.subr.bf16.mxu1 %v2593_v61  ;;  %v2675_v61 = vld [vmem:[#allocation5 + $0x2ac] ss:$28 sps:$4 sm:$0xff]  }
 0x34b   :  { %1879 = vmatpush1.bf16.msra.mxu1 %v2591_v62  ;;  %v2673_v62 = vld [vmem:[#allocation5 + $0x2a8] ss:$28 sps:$4 sm:$0xff]  }
 0x34c   :  { %1880 = vmatprep.subr.bf16.mxu1 %v2596_v63  ;;  %v2678_v63 = vld [vmem:[#allocation5 + $0x2e4] ss:$28 sps:$4 sm:$0xff]  }
 0x34f   :  { %1881 = vmatpush1.bf16.msra.mxu1 %v2594_v0  ;;  %v2676_v0 = vld [vmem:[#allocation5 + $0x2e0] ss:$28 sps:$4 sm:$0xff]  }
 0x350   :  { %1882 = vmatprep.subr.bf16.mxu1 %v2599_v1  ;;  %v2681_v1 = vld [vmem:[#allocation5 + $0x31c] ss:$28 sps:$4 sm:$0xff]  }
 0x353   :  { %1883 = vmatpush1.bf16.msra.mxu1 %v2597_v4  ;;  %v2679_v4 = vld [vmem:[#allocation5 + $0x318] ss:$28 sps:$4 sm:$0xff]  }
 0x354   :  { %1884 = vmatprep.subr.bf16.mxu1 %v2604_v6  ;;  %v2684_v6 = vld [vmem:[#allocation5 + $0x354] ss:$28 sps:$4 sm:$0xff]  }
 0x357   :  { %1885 = vmatpush1.bf16.msra.mxu1 %v2602_v7  ;;  %v2682_v7 = vld [vmem:[#allocation5 + $0x350] ss:$28 sps:$4 sm:$0xff]  }
 0x358   :  { %1886 = vmatprep.subr.bf16.mxu1 %v2609_v8  ;;  %v2687_v8 = vld [vmem:[#allocation5 + $0x14] ss:$28 sps:$4 sm:$0xff]  }
 0x35b   :  { %1887 = vmatpush1.bf16.msra.mxu1 %v2607_v9  ;;  %v2685_v9 = vld [vmem:[#allocation5 + $0x10] ss:$28 sps:$4 sm:$0xff]  }
 0x35c   :  { %1888 = vmatprep.subr.bf16.mxu1 %v2614_v10  ;;  %v2690_v10 = vld [vmem:[#allocation5 + $0x4c] ss:$28 sps:$4 sm:$0xff]  }
 0x35f   :  { %1889 = vmatpush1.bf16.msra.mxu1 %v2612_v11  ;;  %v2688_v11 = vld [vmem:[#allocation5 + $0x48] ss:$28 sps:$4 sm:$0xff]  }
 0x360   :  { %1890 = vmatprep.subr.bf16.mxu1 %v2619_v12  ;;  %v2693_v12 = vld [vmem:[#allocation5 + $0x84] ss:$28 sps:$4 sm:$0xff]  }
 0x363   :  { %1891 = vmatpush1.bf16.msra.mxu1 %v2617_v13  ;;  %v2691_v13 = vld [vmem:[#allocation5 + $0x80] ss:$28 sps:$4 sm:$0xff]  }
 0x364   :  { %1892 = vmatprep.subr.bf16.mxu1 %v2624_v14  ;;  %v2696_v14 = vld [vmem:[#allocation5 + $0xbc] ss:$28 sps:$4 sm:$0xff]  }
 0x367   :  { %1893 = vmatpush1.bf16.msra.mxu1 %v2622_v15  ;;  %v2694_v15 = vld [vmem:[#allocation5 + $0xb8] ss:$28 sps:$4 sm:$0xff]  }
 0x368   :  { %1894 = vmatprep.subr.bf16.mxu1 %v2629_v16  ;;  %v2699_v16 = vld [vmem:[#allocation5 + $0xf4] ss:$28 sps:$4 sm:$0xff]  }
 0x36b   :  { %1895 = vmatpush1.bf16.msra.mxu1 %v2627_v17  ;;  %v2697_v17 = vld [vmem:[#allocation5 + $0xf0] ss:$28 sps:$4 sm:$0xff]  }
 0x36c   :  { %1896 = vmatprep.subr.bf16.mxu1 %v2634_v20  ;;  %v2705_v20 = vld [vmem:[#allocation5 + $0x164] ss:$28 sps:$4 sm:$0xff]  }
 0x36f   :  { %1897 = vmatpush1.bf16.msra.mxu1 %v2632_v21  ;;  %v2703_v21 = vld [vmem:[#allocation5 + $0x160] ss:$28 sps:$4 sm:$0xff]  }
 0x370   :  { %1907 = vmatprep.subr.bf16.mxu1 %v2639_v24  ;;  %v2711_v24 = vld [vmem:[#allocation5 + $0x1d4] ss:$28 sps:$4 sm:$0xff]  }
 0x405   :  { %v1114_v28 = vpop.f32.mrb[4].mxu1 }
 0x406   :  { %v1115_v29 = vadd.f32 %v1114_v28, %v1049_v26  ;;  %v1116_v30 = vpop.f32.mrb[5].mxu1  ;;  %v2714_v26 = vld [vmem:[#allocation5 + $0x20c] ss:$28 sps:$4 sm:$0xff]   ;;  %v2717_v28 = vld [vmem:[#allocation5 + $0x244] ss:$28 sps:$4 sm:$0xff]  }
 0x407   :  { %v1117_v31 = vadd.f32 %v1116_v30, %v1053_v27  ;;  %v1118_v32 = vpop.f32.mrb[6].mxu1  ;;  %v2712_v27 = vld [vmem:[#allocation5 + $0x208] ss:$28 sps:$4 sm:$0xff]   ;;  %v2720_v30 = vld [vmem:[#allocation5 + $0x27c] ss:$28 sps:$4 sm:$0xff]  }
 0x408   :  { %v1121_v33 = vmax.f32 %v1115_v29, 0.0  ;;  %v1119_v34 = vpop.f32.mrb[7].mxu1  ;;  %v2715_v29 = vld [vmem:[#allocation5 + $0x240] ss:$28 sps:$4 sm:$0xff]   ;;  %v2723_v32 = vld [vmem:[#allocation5 + $0x2b4] ss:$28 sps:$4 sm:$0xff]  }
 0x409   :  { %v1122_v35 = vmax.f32 %v1117_v31, 0.0  ;;  %v2718_v31 = vld [vmem:[#allocation5 + $0x278] ss:$28 sps:$4 sm:$0xff]   ;;  %v2726_v34 = vld [vmem:[#allocation5 + $0x2ec] ss:$28 sps:$4 sm:$0xff]  }
 0x40a   :  { %v3060_v38 = vpack.c.bf16 %v1121_v33, %v1121_v33  ;;  %v2721_v33 = vld [vmem:[#allocation5 + $0x2b0] ss:$28 sps:$4 sm:$0xff]  }
 0x40b   :  { %v3058_v36 = vpack.c.bf16 %v1122_v35, %v1122_v35  ;;  %v2724_v35 = vld [vmem:[#allocation5 + $0x2e8] ss:$28 sps:$4 sm:$0xff]  }
 0x40d   :  { %1898 = vmatprep.mubr.bf16.mxu1 %v3058_v36  ;;  %2021 = vmatprep.mubr.bf16.mxu0 %v3058_v36 }
 0x40e   :  { %1899 = vmatmul.mubr.bf16.vlgmr.msra.gmra.mrb[8].mxu1 %v3060_v38  ;;  %2022 = vmatmul.mubr.bf16.vlgmr.msra.gmra.mrb[4].mxu0 %v3060_v38 }
 0x40f   :  { %1908 = vmatpush1.bf16.msra.mxu1 %v2637_v37  ;;  %1939 = vmatprep.mubr.bf16.mxu1 %v3058_v36  ;;  %v2727_v37 = vld [vmem:[#allocation5 + $0x320] ss:$28 sps:$4 sm:$0xff]  }
 0x410   :  { %1909 = vmatprep.subr.bf16.mxu1 %v2642_v39  ;;  %v2732_v39 = vld [vmem:[#allocation5 + $0x35c] ss:$28 sps:$4 sm:$0xff]  }
 0x413   :  { %1910 = vmatpush1.bf16.msra.mxu1 %v2640_v40  ;;  %v2730_v40 = vld [vmem:[#allocation5 + $0x358] ss:$28 sps:$4 sm:$0xff]  }
 0x414   :  { %1911 = vmatprep.subr.bf16.mxu1 %v2645_v41  ;;  %v3073_v41 = vld [vmem:[%s3122_s9] sm:$0xff]  ;;  %s2867_s9 = smov [#allocation8]  }
 0x415   :  { %s2089_s22 = sshll.u32 %s2867_s9, 4  ;;  %s2090_s22 = int_to_ptr.vmem [resolvable:$true] %s2089_s22 }
 0x416   :  { %s2807_s2 = scalar_lea.vmem %s2090_s22, 128  ;;  %p2812_p3 = scmp.lt.s32.totalorder %s2090_s22, %s2090_s22 }
 0x417   :  { %1912 = vmatpush1.bf16.msra.mxu1 %v2643_v42  ;;  %v1281_v42 = vsub.s32 6, %v3022_v2  ;;  %p2808_p2 = scmp.ne.s32.totalorder %s2090_s22, %s2807_s2  ;;  %p2813_p4 = scmp.lt.s32.totalorder %s2807_s2, %s2807_s2 }
 0x418   :  { %1913 = vmatprep.subr.bf16.mxu1 %v2648_v43  ;;  %v1258_v43 = vrot.slane %v3073_v41, %v3025_v3 }
 0x419   :  { %p2814_p5 = por %p2813_p4, %p2812_p3 }
 0x41b   :  { %1914 = vmatpush1.bf16.msra.mxu1 %v2646_v44  ;;  %v1262_v44 = vrot.slane %v3073_v41, %v3031_v5  ;;  %p2815_p6 = pnand %p2814_p5, %p2808_p2 }
 0x41c   :  { %1915 = vmatprep.subr.bf16.mxu1 %v2651_v45 }
 0x41f   :  { %1916 = vmatpush1.bf16.msra.mxu1 %v2649_v46 }
 0x420   :  { %1917 = vmatprep.subr.bf16.mxu1 %v2654_v47  ;;  %v1282_v47 = vrot.slane %v3073_v41, %v1281_v42 }
 0x423   :  { %1918 = vmatpush1.bf16.msra.mxu1 %v2652_v48 }
 0x424   :  { %1919 = vmatprep.subr.bf16.mxu1 %v2657_v49 }
 0x427   :  { %1920 = vmatpush1.bf16.msra.mxu1 %v2655_v50 }
 0x428   :  { %1921 = vmatprep.subr.bf16.mxu1 %v2660_v51 }
 0x42b   :  { %1922 = vmatpush1.bf16.msra.mxu1 %v2658_v52 }
 0x42c   :  { %1923 = vmatprep.subr.bf16.mxu1 %v2663_v53 }
 0x42f   :  { %1924 = vmatpush1.bf16.msra.mxu1 %v2661_v54 }
 0x430   :  { %1925 = vmatprep.subr.bf16.mxu1 %v2666_v55 }
 0x433   :  { %1926 = vmatpush1.bf16.msra.mxu1 %v2664_v56 }
 0x434   :  { %1927 = vmatprep.subr.bf16.mxu1 %v2669_v57 }
 0x437   :  { %1928 = vmatpush1.bf16.msra.mxu1 %v2667_v58 }
 0x438   :  { %1929 = vmatprep.subr.bf16.mxu1 %v2672_v59 }
 0x43b   :  { %1930 = vmatpush1.bf16.msra.mxu1 %v2670_v60 }
 0x43c   :  { %1931 = vmatprep.subr.bf16.mxu1 %v2675_v61 }
 0x43f   :  { %1932 = vmatpush1.bf16.msra.mxu1 %v2673_v62 }
 0x440   :  { %1933 = vmatprep.subr.bf16.mxu1 %v2678_v63 }
 0x443   :  { %1934 = vmatpush1.bf16.msra.mxu1 %v2676_v0 }
 0x444   :  { %1935 = vmatprep.subr.bf16.mxu1 %v2681_v1 }
 0x447   :  { %1936 = vmatpush1.bf16.msra.mxu1 %v2679_v4 }
 0x448   :  { %1937 = vmatprep.subr.bf16.mxu1 %v2684_v6 }
 0x44b   :  { %1938 = vmatpush1.bf16.msra.mxu1 %v2682_v7 }
 0x44c   :  { %1948 = vmatprep.subr.bf16.mxu1 %v2687_v8 }
 0x44e   :  { %1940 = vmatmul.mubr.bf16.vlgmr.msra.gmra.mrb[12].mxu1 %v3060_v38 }
 0x44f   :  { %1949 = vmatpush1.bf16.msra.mxu1 %v2685_v9  ;;  %1980 = vmatprep.mubr.bf16.mxu1 %v3058_v36  ;;  %v2729_v36 = vld [vmem:[#allocation5 + $0x324] ss:$28 sps:$4 sm:$0xff]  }
 0x450   :  { %1950 = vmatprep.subr.bf16.mxu1 %v2690_v10 }
 0x453   :  { %1951 = vmatpush1.bf16.msra.mxu1 %v2688_v11 }
 0x454   :  { %1952 = vmatprep.subr.bf16.mxu1 %v2693_v12 }
 0x457   :  { %1953 = vmatpush1.bf16.msra.mxu1 %v2691_v13 }
 0x458   :  { %1954 = vmatprep.subr.bf16.mxu1 %v2696_v14 }
 0x45b   :  { %1955 = vmatpush1.bf16.msra.mxu1 %v2694_v15 }
 0x45c   :  { %1956 = vmatprep.subr.bf16.mxu1 %v2699_v16 }
 0x45f   :  { %1957 = vmatpush1.bf16.msra.mxu1 %v2697_v17 }
 0x460   :  { %1958 = vmatprep.subr.bf16.mxu1 %v2702_v18 }
 0x463   :  { %1959 = vmatpush1.bf16.msra.mxu1 %v2700_v19 }
 0x464   :  { %1960 = vmatprep.subr.bf16.mxu1 %v2705_v20 }
 0x467   :  { %1961 = vmatpush1.bf16.msra.mxu1 %v2703_v21 }
 0x468   :  { %1962 = vmatprep.subr.bf16.mxu1 %v2708_v22 }
 0x46b   :  { %1963 = vmatpush1.bf16.msra.mxu1 %v2706_v23 }
 0x46c   :  { %1964 = vmatprep.subr.bf16.mxu1 %v2711_v24 }
 0x46f   :  { %1965 = vmatpush1.bf16.msra.mxu1 %v2709_v25 }
 0x470   :  { %1966 = vmatprep.subr.bf16.mxu1 %v2714_v26 }
 0x473   :  { %1967 = vmatpush1.bf16.msra.mxu1 %v2712_v27 }
 0x474   :  { %1968 = vmatprep.subr.bf16.mxu1 %v2717_v28 }
 0x477   :  { %1969 = vmatpush1.bf16.msra.mxu1 %v2715_v29 }
 0x478   :  { %1970 = vmatprep.subr.bf16.mxu1 %v2720_v30 }
 0x47b   :  { %1971 = vmatpush1.bf16.msra.mxu1 %v2718_v31 }
 0x47c   :  { %1972 = vmatprep.subr.bf16.mxu1 %v2723_v32 }
 0x47f   :  { %1973 = vmatpush1.bf16.msra.mxu1 %v2721_v33 }
 0x480   :  { %1974 = vmatprep.subr.bf16.mxu1 %v2726_v34 }
 0x483   :  { %1975 = vmatpush1.bf16.msra.mxu1 %v2724_v35 }
 0x484   :  { %1976 = vmatprep.subr.bf16.mxu1 %v2729_v36 }
 0x487   :  { %1977 = vmatpush1.bf16.msra.mxu1 %v2727_v37 }
 0x488   :  { %1978 = vmatprep.subr.bf16.mxu1 %v2732_v39 }
 0x48b   :  { %1979 = vmatpush1.bf16.msra.mxu1 %v2730_v40 }
 0x48e   :  { %1981 = vmatmul.mubr.bf16.vlgmr.msra.gmra.mrb[16].mxu1 %v3060_v38 }
 0x4e1   :  { %v1900_v45 = vpop.f32.mrb[8].mxu1  ;;  %v2374_v46 = vpop.f32.mrb[4].mxu0 }
 0x4e2   :  { %v1901_v48 = vadd.f32 %v1900_v45, %v1258_v43  ;;  %v1902_v49 = vpop.f32.mrb[9].mxu1  ;;  %v2375_v38 = vpop.f32.mrb[5].mxu0 }
 0x4e3   :  { %v1903_v50 = vadd.f32 %v1902_v49, %v1262_v44  ;;  %v2376_v51 = vadd.f32 %v2375_v38, %v2374_v46  ;;  %v1904_v52 = vpop.f32.mrb[10].mxu1  ;;  %v2377_v53 = vpop.f32.mrb[6].mxu0 }
 0x4e4   :  { %v2029_v54 = vsub.f32 0.0, %v1901_v48  ;;  %v1905_v55 = vpop.f32.mrb[11].mxu1  ;;  %v2378_v56 = vpop.f32.mrb[7].mxu0 }
 0x4e5   :  { %v2030_v57 = vsub.f32 0.0, %v1903_v50  ;;  %v2024_v58 = vadd.f32 %v2376_v51, %v1282_v47 }
 0x4e6   :  { %v2036_v3 = vmul.f32 1.442695, %v2029_v54 }
 0x4e7   :  { %v2038_v59 = vmul.f32 1.442695, %v2030_v57  ;;  %v2035_v60 = vsub.f32 0.0, %v2024_v58 }
 0x4e8   :  { %2735 = vpow2.f32 %v2036_v3 }
 0x4e9   :  { %2737 = vpow2.f32 %v2038_v59  ;;  %v2048_v5 = vmul.f32 1.442695, %v2035_v60 }
 0x4eb   :  { %2739 = vpow2.f32 %v2048_v5 }
 0x4f2   :  { %v2736_v61 = vpop.eup %2735 }
 0x4f3   :  { %v2738_v62 = vpop.eup %2737  ;;  %v2050_v63 = vadd.f32 1.0, %v2736_v61 }
 0x4f4   :  { %v2051_v0 = vadd.f32 1.0, %v2738_v62 }
 0x4f5   :  { %v2740_v1 = vpop.eup %2739  ;;  %2741 = vrcp.f32 %v2050_v63 }
 0x4f6   :  { %2743 = vrcp.f32 %v2051_v0  ;;  %v2056_v4 = vadd.f32 1.0, %v2740_v1 }
 0x4f8   :  { %2745 = vrcp.f32 %v2056_v4 }
 0x4ff   :  { %v2742_v6 = vpop.eup %2741 }
 0x500   :  { %v2744_v7 = vpop.eup %2743  ;;  %2064 = vst [vmem:[#allocation7] sm:$0xff] %v2742_v6 }
 0x501   :  { %2065 = vst [vmem:[#allocation7 + $0x8] sm:$0xff] %v2744_v7 }
 0x502   :  { %v2746_v8 = vpop.eup %2745 }
 0x503   :  { %2818 = shalt.err (!%p2815_p6)
}
 0x504   :  { %s2819_s24 = scalar_lea.hbm %s3124_s11, 128 }
 0x505   :  { %p2820_p7 = scmp.ne.s32.totalorder %s3124_s11, %s2819_s24  ;;  %p2823_p8 = scmp.lt.u32.totalorder %s2819_s24, %s3124_s11 }
 0x507   :  { %p2825_p9 = pnand %p2823_p8, %p2820_p7 }
 0x509   :  { %2828 = shalt.err (!%p2825_p9)
}
 0x50a   :  { %2092 = dma.vmem_to_hbm [thread:$0]  %s2090_s22, 128, %s3124_s11, [#allocation9]   ;;  %2070 = vst [vmem:[#allocation7 + $0x30] sm:$0xff] %v2746_v8  ;;  %v1265_v9 = vsub.s32 2, %v3022_v2  ;;  %v1269_v10 = vsub.s32 3, %v3022_v2  ;;  %v1273_v29 = vsub.s32 4, %v3022_v2 }
 0x50b   :  { %v1277_v30 = vsub.s32 5, %v3022_v2  ;;  %s2868_s11 = smov [#allocation7]  }
 0x50c   :  { %v1266_v11 = vrot.slane %v3073_v41, %v1265_v9  ;;  %v1270_v12 = vrot.slane %v3073_v41, %v1269_v10  ;;  %v1274_v31 = vrot.slane %v3073_v41, %v1273_v29  ;;  %s2079_s3 = sshll.u32 %s2868_s11, 4  ;;  %s2080_s3 = int_to_ptr.vmem [resolvable:$true] %s2079_s3 }
 0x50d   :  { %v1278_v32 = vrot.slane %v3073_v41, %v1277_v30  ;;  %s2829_s4 = scalar_lea.vmem %s2080_s3, 896  ;;  %p2834_p11 = scmp.lt.s32.totalorder %s2080_s3, %s2080_s3 }
 0x50e   :  { %p2830_p10 = scmp.ne.s32.totalorder %s2080_s3, %s2829_s4  ;;  %p2835_p12 = scmp.lt.s32.totalorder %s2829_s4, %s2829_s4 }
 0x510   :  { %p2836_p13 = por %p2835_p12, %p2834_p11 }
 0x512   :  { %p2837_p0 = pnand %p2836_p13, %p2830_p10 }
 0x521   :  { %v1941_v13 = vpop.f32.mrb[12].mxu1 }
 0x522   :  { %v1942_v14 = vadd.f32 %v1941_v13, %v1266_v11  ;;  %v1943_v15 = vpop.f32.mrb[13].mxu1 }
 0x523   :  { %v1944_v16 = vadd.f32 %v1943_v15, %v1270_v12  ;;  %v1945_v17 = vpop.f32.mrb[14].mxu1 }
 0x524   :  { %v2031_v18 = vsub.f32 0.0, %v1942_v14  ;;  %v1946_v19 = vpop.f32.mrb[15].mxu1 }
 0x525   :  { %v2032_v20 = vsub.f32 0.0, %v1944_v16 }
 0x526   :  { %v2040_v21 = vmul.f32 1.442695, %v2031_v18 }
 0x527   :  { %v2042_v22 = vmul.f32 1.442695, %v2032_v20 }
 0x528   :  { %2747 = vpow2.f32 %v2040_v21 }
 0x529   :  { %2749 = vpow2.f32 %v2042_v22 }
 0x532   :  { %v2748_v23 = vpop.eup %2747 }
 0x533   :  { %v2750_v24 = vpop.eup %2749  ;;  %v2052_v25 = vadd.f32 1.0, %v2748_v23 }
 0x534   :  { %v2053_v26 = vadd.f32 1.0, %v2750_v24 }
 0x535   :  { %2751 = vrcp.f32 %v2052_v25 }
 0x536   :  { %2753 = vrcp.f32 %v2053_v26 }
 0x53f   :  { %v2752_v27 = vpop.eup %2751 }
 0x540   :  { %v2754_v28 = vpop.eup %2753  ;;  %2066 = vst [vmem:[#allocation7 + $0x10] sm:$0xff] %v2752_v27 }
 0x541   :  { %2067 = vst [vmem:[#allocation7 + $0x18] sm:$0xff] %v2754_v28 }
 0x561   :  { %v1982_v33 = vpop.f32.mrb[16].mxu1 }
 0x562   :  { %v1983_v34 = vadd.f32 %v1982_v33, %v1274_v31  ;;  %v1984_v35 = vpop.f32.mrb[17].mxu1 }
 0x563   :  { %v1985_v36 = vadd.f32 %v1984_v35, %v1278_v32  ;;  %v1986_v37 = vpop.f32.mrb[18].mxu1 }
 0x564   :  { %v2033_v39 = vsub.f32 0.0, %v1983_v34  ;;  %v1987_v40 = vpop.f32.mrb[19].mxu1 }
 0x565   :  { %v2034_v42 = vsub.f32 0.0, %v1985_v36 }
 0x566   :  { %v2044_v43 = vmul.f32 1.442695, %v2033_v39 }
 0x567   :  { %v2046_v44 = vmul.f32 1.442695, %v2034_v42 }
 0x568   :  { %2755 = vpow2.f32 %v2044_v43 }
 0x569   :  { %2757 = vpow2.f32 %v2046_v44 }
 0x572   :  { %v2756_v45 = vpop.eup %2755 }
 0x573   :  { %v2758_v46 = vpop.eup %2757  ;;  %v2054_v47 = vadd.f32 1.0, %v2756_v45 }
 0x574   :  { %v2055_v2 = vadd.f32 1.0, %v2758_v46 }
 0x575   :  { %2759 = vrcp.f32 %v2054_v47 }
 0x576   :  { %2761 = vrcp.f32 %v2055_v2 }
 0x57f   :  { %v2760_v41 = vpop.eup %2759 }
 0x580   :  { %v2762_v48 = vpop.eup %2761  ;;  %2068 = vst [vmem:[#allocation7 + $0x20] sm:$0xff] %v2760_v41 }
 0x581   :  { %2069 = vst [vmem:[#allocation7 + $0x28] sm:$0xff] %v2762_v48 }
 0x582   :  { %2840 = shalt.err (!%p2837_p0)
}
 0x583   :  { %s2841_s12 = scalar_lea.hbm %s3123_s10, 896 }
 0x584   :  { %p2842_p1 = scmp.ne.s32.totalorder %s3123_s10, %s2841_s12  ;;  %p2845_p2 = scmp.lt.u32.totalorder %s2841_s12, %s3123_s10 }
 0x586   :  { %p2847_p3 = pnand %p2845_p2, %p2842_p1 }
 0x588   :  { %2850 = shalt.err (!%p2847_p3)
}
 0x589   :  { %2082 = dma.vmem_to_hbm [thread:$0]  %s2080_s3, 896, %s3123_s10, [#allocation4]  }
 0x58a   :  { %2855 = dma.done.wait [#allocation4], 896  }
 0x58b   :  { %2856 = vsyncadd [#allocation4], 4294966400 }
 0x58c   :  { %2857 = dma.done.wait [#allocation9], 128  }
 0x58d   :  { %2858 = vsyncadd [#allocation9], 4294967168 }
 0x58e   :  { %2099 = vsyncpa [#allocation3], 1 }
 0x58f   :  { %2100 = vsyncpa [#allocation6], 1 }
 0x590   :  { %2101 = vsyncpa [#allocation4], 1 }
 0x591   :  { %2102 = vsyncpa [#allocation9], 1 }

</bundles_post_ra>
